<compile_context>
chip_gen: v7x
topology: tpu7x:2x2x1
jax: 0.10.0
libtpu: 0.0.40
codegen_flags: <defaults>
</compile_context>

<pallas_src>
import functools

import jax
import jax.numpy as jnp
from jax.experimental import pallas as pl
from jax.experimental.pallas import tpu as pltpu
from jax.scipy.linalg import block_diag

PATCH = 4            # patch size of the synthetic patch embed
HIDDEN = 32          # synthetic backbone width
N_FEATS = 3          # features extracted after blocks 0, 1, 2
COS_EPS = 1e-8       # torch F.cosine_similarity eps
SEG_N = 128          # lane-padded width of the segment-sum reduction matrix
TILE_R_MAX = 2048    # max packed rows per grid step (well inside 48 MiB VMEM)
DEFAULT_GROUP = 4    # patches packed per lane row (4 -> 128 lanes; 8 on v6e/v7x)


def _gelu(x):
    return jax.nn.gelu(x, approximate=True)


def _round_up(x, m):
    return (x + m - 1) // m * m


def _cdiv(a, b):
    return -(-a // b)


def _patchify(x_nchw):
    B, C, H, W = x_nchw.shape
    hp, wp = H // PATCH, W // PATCH
    p = x_nchw.reshape(B, C, hp, PATCH, wp, PATCH)
    p = p.transpose(0, 2, 4, 1, 3, 5).reshape(B * hp * wp, C * PATCH * PATCH)
    return p, hp * wp


def _prep_inputs(x, compute_dtype):
    # torch.nan_to_num(nan=0.0); +/-inf clamped to the finite max of the MXU
    # compute dtype so bf16 matmuls cannot re-introduce inf/NaN.  This fuses
    # with the patchify transpose / cast into a single XLA pass.
    finfo = jnp.finfo(compute_dtype)
    x = jnp.nan_to_num(x, nan=0.0, posinf=float(finfo.max), neginf=float(finfo.min))
    p, n = _patchify(x)
    return p.astype(compute_dtype), n


def _pack_params(params, group, compute_dtype):
    """Block-diagonal (lane-packed) weights + tiled biases + segment-sum matrix."""
    w0, b0, w1, b1, w2, b2, w3, b3 = params
    H = w0.shape[1]

    def bd(w):   # group-copy block-diagonal weight, pre-cast to MXU dtype
        return block_diag(*([w] * group)).astype(compute_dtype)

    def tb(b):   # tiled bias, kept f32 (added to the f32 accumulator)
        return jnp.tile(b, (1, group)).astype(jnp.float32)

    GH = group * H
    lane = jnp.arange(GH) // H                      # patch slot owning each lane
    seg = jnp.zeros((GH, SEG_N), jnp.float32).at[jnp.arange(GH), lane].set(1.0)

    packed = (bd(w0), tb(b0), bd(w1), tb(b1), bd(w2), tb(b2), bd(w3), tb(b3))
    return packed, seg.astype(compute_dtype)


def _choose_tile_rows(R):
    R8 = _round_up(max(R, 1), 8)
    if R8 <= 8:
        return 8
    # Cap tile size for VMEM headroom; prefer an even tile count so both of
    # v7x's TensorCores get work on the "parallel" grid axis.
    n = max(2, _cdiv(R8, TILE_R_MAX))
    if n % 2:
        n += 1
    return _round_up(_cdiv(R8, n), 8)


# ----------------------------------------------------------------------------
# Fused kernel: per packed-row tile, extract pred & target features (MXU
# matmuls with resident block-diagonal weights) and reduce the cosine-
# similarity contribution of the tile's patches.
# ----------------------------------------------------------------------------
def fused_percept_kernel(xp_ref, xt_ref,
                         w0_ref, b0_ref, w1_ref, b1_ref,
                         w2_ref, b2_ref, w3_ref, b3_ref, seg_ref,
                         out_ref, *, tile_r, group, m_real, compute_dtype):
    """xp_ref/xt_ref: (tile_r, group*D) lane-packed patch rows (compute dtype,
                      already nan-sanitized in the wrapper).
    w*/b*/seg:        block-diagonal weights / tiled f32 biases / 0-1 segment
                      sum matrix, resident in VMEM (constant index maps).
    out_ref:          (1, 8, 128) per-tile partial sum of cosine similarities
                      (scalar broadcast over the block; summed outside)."""
    xp = xp_ref[...]
    xt = xt_ref[...]

    def linear(h, w_ref, b_ref):
        # MXU matmul in compute dtype (bf16 default), f32 accumulation + bias.
        return (jnp.dot(h, w_ref[...], preferred_element_type=jnp.float32)
                + b_ref[...])

    hp = linear(xp, w0_ref, b0_ref)      # block-diagonal patch embed (no act)
    ht = linear(xt, w0_ref, b0_ref)

    # Patch-validity mask: packed row r, slot g holds patch group*(row0+r)+g.
    row0 = pl.program_id(0) * tile_r
    rows = jax.lax.broadcasted_iota(jnp.int32, (tile_r, SEG_N), 0)
    cols = jax.lax.broadcasted_iota(jnp.int32, (tile_r, SEG_N), 1)
    valid = ((group * (row0 + rows) + cols < m_real)
             & (cols < group)).astype(jnp.float32)

    seg = seg_ref[...]                   # (group*HIDDEN, 128) 0/1 matrix
    eps2 = jnp.float32(COS_EPS * COS_EPS)
    partial = jnp.zeros((1, 1), jnp.float32)
    for w_ref, b_ref in ((w1_ref, b1_ref), (w2_ref, b2_ref), (w3_ref, b3_ref)):
        hp = _gelu(linear(hp.astype(compute_dtype), w_ref, b_ref))
        ht = _gelu(linear(ht.astype(compute_dtype), w_ref, b_ref))
        # Per-patch dot / |p|^2 / |t|^2 via one segment-sum matmul each (MXU).
        dot = jnp.dot((hp * ht).astype(compute_dtype), seg,
                      preferred_element_type=jnp.float32)
        pp = jnp.dot((hp * hp).astype(compute_dtype), seg,
                     preferred_element_type=jnp.float32)
        tt = jnp.dot((ht * ht).astype(compute_dtype), seg,
                     preferred_element_type=jnp.float32)
        # torch F.cosine_similarity: dot / sqrt(clamp(|p|^2*|t|^2, eps^2)).
        # rsqrt goes to the EUP slot (free vs. the MXU/VPU-bound rest).
        cos = dot * jax.lax.rsqrt(jnp.maximum(pp * tt, eps2))
        partial = partial + jnp.sum(cos * valid, axis=(0, 1), keepdims=True)

    out_ref[...] = jnp.broadcast_to(partial.reshape(1, 1, 1), out_ref.shape)


# ----------------------------------------------------------------------------
# Wrapper (patchify / packing / pallas_call plumbing + scalar epilogue)
# ----------------------------------------------------------------------------
def perceptual_loss(preds, targets, params, *,
                    compute_dtype=jnp.bfloat16, group=DEFAULT_GROUP):
    # preprocess_inputs=False path of TimmPerceptualLoss.forward
    B = preds.shape[0]
    D = params[0].shape[0]

    xp, n_patches = _prep_inputs(preds, compute_dtype)
    xt, _ = _prep_inputs(targets, compute_dtype)
    M = xp.shape[0]                                   # number of real patches

    R = _cdiv(M, group)                               # packed rows
    tile_r = _choose_tile_rows(R)
    r_pad = _round_up(max(R, 1), tile_r)
    n_tiles = r_pad // tile_r

    def pack_rows(x):
        x = jnp.pad(x, ((0, r_pad * group - M), (0, 0)))
        return x.reshape(r_pad, group * D)            # free row-major reshape

    xp = pack_rows(xp)
    xt = pack_rows(xt)

    packed_params, seg = _pack_params(params, group, compute_dtype)
    GD = group * D
    GH = group * HIDDEN

    row_spec = pl.BlockSpec((tile_r, GD), lambda i: (i, 0))
    const = lambda i: (0, 0)         # weights resident in VMEM across the grid
    in_specs = [
        row_spec, row_spec,
        pl.BlockSpec((GD, GH), const), pl.BlockSpec((1, GH), const),
        pl.BlockSpec((GH, GH), const), pl.BlockSpec((1, GH), const),
        pl.BlockSpec((GH, GH), const), pl.BlockSpec((1, GH), const),
        pl.BlockSpec((GH, GH), const), pl.BlockSpec((1, GH), const),
        pl.BlockSpec((GH, SEG_N), const),
    ]
    out_specs = pl.BlockSpec((1, 8, 128), lambda i: (i, 0, 0))

    inp_bytes = jnp.dtype(compute_dtype).itemsize
    flops = int(r_pad * (2 * (2 * GD * GH)
                         + 3 * (2 * (2 * GH * GH) + 3 * 2 * GH * SEG_N)))
    transcendentals = int(r_pad * (2 * 3 * GH + 3 * SEG_N))
    bytes_accessed = int(2 * r_pad * GD * inp_bytes
                         + (GD * GH + 3 * GH * GH + GH * SEG_N) * inp_bytes
                         + 4 * GH * 4 + n_tiles * 8 * 128 * 4)

    partials = pl.pallas_call(
        functools.partial(fused_percept_kernel, tile_r=tile_r, group=group,
                          m_real=M, compute_dtype=compute_dtype),
        out_shape=jax.ShapeDtypeStruct((n_tiles, 8, 128), jnp.float32),
        grid=(n_tiles,),
        in_specs=in_specs,
        out_specs=out_specs,
        compiler_params=pltpu.CompilerParams(
            dimension_semantics=("parallel",),
            vmem_limit_bytes=48 * 1024 * 1024),
        cost_estimate=pl.CostEstimate(flops=flops,
                                      transcendentals=transcendentals,
                                      bytes_accessed=bytes_accessed),
    )(xp, xt, *packed_params, seg)

    total_cos = jnp.sum(partials[:, 0, 0])
    # loss = mean_b( sum_f(1 - mean_n cos) / B ) = (F*B - sum_{f,b,n} cos / N) / B^2
    return (jnp.float32(N_FEATS * B) - total_cos / jnp.float32(n_patches)) \
        / jnp.float32(B * B)


# ----------------------------------------------------------------------------
# Pure-JAX reference (mirrors the PyTorch forward semantics exactly)
# ----------------------------------------------------------------------------
def perceptual_loss_ref(preds, targets, params):
    def feats(x):
        x = jnp.nan_to_num(x)
        p, n = _patchify(x)
        w0, b0, w1, b1, w2, b2, w3, b3 = params
        h = p @ w0 + b0
        h1 = _gelu(h @ w1 + b1)
        h2 = _gelu(h1 @ w2 + b2)
        h3 = _gelu(h2 @ w3 + b3)
        B = x.shape[0]
        return [f.reshape(B, n, HIDDEN) for f in (h1, h2, h3)]

    fps, fts = feats(preds), feats(targets)
    B = preds.shape[0]
    loss = jnp.zeros((B,), jnp.float32)
    for fp, ft in zip(fps, fts):
        dot = jnp.sum(fp * ft, axis=-1)
        pp = jnp.sum(fp * fp, axis=-1)
        tt = jnp.sum(ft * ft, axis=-1)
        # modern torch F.cosine_similarity clamps the product of norms at eps
        cos = dot / jnp.sqrt(jnp.maximum(pp * tt, COS_EPS * COS_EPS))
        loss = loss + (1.0 - jnp.mean(cos, axis=-1))
    loss = loss / B
    return jnp.mean(loss)


if __name__ == "__main__":
    key = jax.random.PRNGKey(0)
    k_pred, k_tgt, k_param = jax.random.split(key, 3)

    B, C, H, W = 2, 4, 16, 16
    preds = jax.random.normal(k_pred, (B, C, H, W), jnp.float32)
    targets = jax.random.normal(k_tgt, (B, C, H, W), jnp.float32)
    # exercise the nan_to_num path
    preds = preds.at[0, 0, 0, 0].set(jnp.nan)

    D = C * PATCH * PATCH
    pk = jax.random.split(k_param, 8)

    def _w(k, fan_in, shape):
        return jax.random.normal(k, shape, jnp.float32) / jnp.sqrt(float(fan_in))

    params = (
        _w(pk[0], D, (D, HIDDEN)),           0.01 * jax.random.normal(pk[1], (1, HIDDEN), jnp.float32),
        _w(pk[2], HIDDEN, (HIDDEN, HIDDEN)), 0.01 * jax.random.normal(pk[3], (1, HIDDEN), jnp.float32),
        _w(pk[4], HIDDEN, (HIDDEN, HIDDEN)), 0.01 * jax.random.normal(pk[5], (1, HIDDEN), jnp.float32),
        _w(pk[6], HIDDEN, (HIDDEN, HIDDEN)), 0.01 * jax.random.normal(pk[7], (1, HIDDEN), jnp.float32),
    )

    ref = perceptual_loss_ref(preds, targets, params)

    # f32 MXU path — tight check against the reference.
    loss_f32 = perceptual_loss(preds, targets, params, compute_dtype=jnp.float32)
    jax.block_until_ready(loss_f32)
    assert jnp.isfinite(loss_f32), "f32 loss is not finite"
    assert jnp.allclose(loss_f32, ref, rtol=1e-3, atol=5e-4), (loss_f32, ref)

    # Default bf16 MXU path (v5e/v6e/v7x perf) — f32 accumulation / reductions,
    # bf16 operands & HBM traffic; looser tolerance.
    loss = perceptual_loss(preds, targets, params)
    jax.block_until_ready(loss)
    assert jnp.isfinite(loss), "bf16 loss is not finite"
    assert jnp.allclose(loss, ref, rtol=1e-1, atol=3e-2), (loss, ref)

    # TODO(synk): preprocess_inputs=True branch (timm mean/std normalize +
    # antialiased bilinear resize) is not implemented; only the default
    # preprocess_inputs=False path is reproduced.
    # TODO(synk): the real pretrained timm backbone cannot be loaded here; a
    # deterministic synthetic patch-embed + 3 GELU blocks stands in for it.
    print("KERNEL_OK")
</pallas_src>

<mosaic_0001>
module attributes {stable_mosaic.version = 11 : i64} {
  func.func @fused_percept_kernel(%arg0: i32, %arg1: memref<8x256xf32, #tpu.memory_space<vmem>>, %arg2: memref<8x256xf32, #tpu.memory_space<vmem>>, %arg3: memref<256x128xf32, #tpu.memory_space<vmem>>, %arg4: memref<1x128xf32, #tpu.memory_space<vmem>>, %arg5: memref<128x128xf32, #tpu.memory_space<vmem>>, %arg6: memref<1x128xf32, #tpu.memory_space<vmem>>, %arg7: memref<128x128xf32, #tpu.memory_space<vmem>>, %arg8: memref<1x128xf32, #tpu.memory_space<vmem>>, %arg9: memref<128x128xf32, #tpu.memory_space<vmem>>, %arg10: memref<1x128xf32, #tpu.memory_space<vmem>>, %arg11: memref<128x128xf32, #tpu.memory_space<vmem>>, %arg12: memref<1x8x128xf32, #tpu.memory_space<vmem>>) attributes {dimension_semantics = [#tpu.dimension_semantics<parallel>], iteration_bounds = array<i64: 1>, scalar_prefetch = 0 : i64, scratch_operands = 0 : i64, tpu.core_type = #tpu.core_type<tc>, window_params = [{transform_indices = @transform_0, window_bounds = array<i64: 8, 256>}, {transform_indices = @transform_1, window_bounds = array<i64: 8, 256>}, {pipeline_mode = #tpu.pipeline_mode<synchronous>, transform_indices = @transform_2, window_bounds = array<i64: 256, 128>}, {pipeline_mode = #tpu.pipeline_mode<synchronous>, transform_indices = @transform_3, window_bounds = array<i64: 1, 128>}, {pipeline_mode = #tpu.pipeline_mode<synchronous>, transform_indices = @transform_4, window_bounds = array<i64: 128, 128>}, {pipeline_mode = #tpu.pipeline_mode<synchronous>, transform_indices = @transform_5, window_bounds = array<i64: 1, 128>}, {pipeline_mode = #tpu.pipeline_mode<synchronous>, transform_indices = @transform_6, window_bounds = array<i64: 128, 128>}, {pipeline_mode = #tpu.pipeline_mode<synchronous>, transform_indices = @transform_7, window_bounds = array<i64: 1, 128>}, {pipeline_mode = #tpu.pipeline_mode<synchronous>, transform_indices = @transform_8, window_bounds = array<i64: 128, 128>}, {pipeline_mode = #tpu.pipeline_mode<synchronous>, transform_indices = @transform_9, window_bounds = array<i64: 1, 128>}, {pipeline_mode = #tpu.pipeline_mode<synchronous>, transform_indices = @transform_10, window_bounds = array<i64: 128, 128>}, {transform_indices = @transform_11, window_bounds = array<i64: 1, 8, 128>}]} {
    %c0 = arith.constant 0 : index
    %c0_0 = arith.constant 0 : index
    %0 = vector.load %arg1[%c0, %c0_0] : memref<8x256xf32, #tpu.memory_space<vmem>>, vector<8x256xf32>
    %c0_1 = arith.constant 0 : index
    %c0_2 = arith.constant 0 : index
    %1 = vector.load %arg2[%c0_1, %c0_2] : memref<8x256xf32, #tpu.memory_space<vmem>>, vector<8x256xf32>
    %c0_3 = arith.constant 0 : index
    %c0_4 = arith.constant 0 : index
    %2 = vector.load %arg3[%c0_3, %c0_4] : memref<256x128xf32, #tpu.memory_space<vmem>>, vector<256x128xf32>
    %cst = arith.constant dense<0.000000e+00> : vector<8x128xf32>
    %3 = tpu.matmul %0, %2, %cst {dimension_numbers = #tpu.dot_dimension_numbers<[1], [0], [0], [1], [0, 0, 1, 1], [], []>} : vector<8x256xf32>, vector<256x128xf32>, vector<8x128xf32> -> vector<8x128xf32>
    %c0_5 = arith.constant 0 : index
    %c0_6 = arith.constant 0 : index
    %4 = vector.load %arg4[%c0_5, %c0_6] : memref<1x128xf32, #tpu.memory_space<vmem>>, vector<1x128xf32>
    %5 = vector.broadcast %4 : vector<1x128xf32> to vector<8x128xf32>
    %6 = arith.addf %3, %5 : vector<8x128xf32>
    %c0_7 = arith.constant 0 : index
    %c0_8 = arith.constant 0 : index
    %7 = vector.load %arg3[%c0_7, %c0_8] : memref<256x128xf32, #tpu.memory_space<vmem>>, vector<256x128xf32>
    %cst_9 = arith.constant dense<0.000000e+00> : vector<8x128xf32>
    %8 = tpu.matmul %1, %7, %cst_9 {dimension_numbers = #tpu.dot_dimension_numbers<[1], [0], [0], [1], [0, 0, 1, 1], [], []>} : vector<8x256xf32>, vector<256x128xf32>, vector<8x128xf32> -> vector<8x128xf32>
    %c0_10 = arith.constant 0 : index
    %c0_11 = arith.constant 0 : index
    %9 = vector.load %arg4[%c0_10, %c0_11] : memref<1x128xf32, #tpu.memory_space<vmem>>, vector<1x128xf32>
    %10 = vector.broadcast %9 : vector<1x128xf32> to vector<8x128xf32>
    %11 = arith.addf %8, %10 : vector<8x128xf32>
    %c8_i32 = arith.constant 8 : i32
    %12 = arith.muli %arg0, %c8_i32 : i32
    %13 = tpu.iota {dimensions = array<i32: 0>} : vector<8x128xi32>
    %14 = tpu.iota {dimensions = array<i32: 1>} : vector<8x128xi32>
    %15 = vector.broadcast %12 : i32 to vector<8x128xi32>
    %16 = arith.addi %15, %13 : vector<8x128xi32>
    %c4_i32 = arith.constant 4 : i32
    %17 = vector.broadcast %c4_i32 : i32 to vector<8x128xi32>
    %18 = arith.muli %17, %16 : vector<8x128xi32>
    %19 = arith.addi %18, %14 : vector<8x128xi32>
    %c32_i32 = arith.constant 32 : i32
    %20 = vector.broadcast %c32_i32 : i32 to vector<8x128xi32>
    %21 = arith.cmpi slt, %19, %20 : vector<8x128xi32>
    %c4_i32_12 = arith.constant 4 : i32
    %22 = vector.broadcast %c4_i32_12 : i32 to vector<8x128xi32>
    %23 = arith.cmpi slt, %14, %22 : vector<8x128xi32>
    %24 = arith.andi %21, %23 : vector<8x128xi1>
    %25 = arith.extui %24 : vector<8x128xi1> to vector<8x128xi32>
    %26 = arith.sitofp %25 : vector<8x128xi32> to vector<8x128xf32>
    %c0_13 = arith.constant 0 : index
    %c0_14 = arith.constant 0 : index
    %27 = vector.load %arg11[%c0_13, %c0_14] : memref<128x128xf32, #tpu.memory_space<vmem>>, vector<128x128xf32>
    %cst_15 = arith.constant 0.000000e+00 : f32
    %28 = vector.broadcast %cst_15 : f32 to vector<1x1xf32>
    %c0_16 = arith.constant 0 : index
    %c0_17 = arith.constant 0 : index
    %29 = vector.load %arg5[%c0_16, %c0_17] : memref<128x128xf32, #tpu.memory_space<vmem>>, vector<128x128xf32>
    %cst_18 = arith.constant dense<0.000000e+00> : vector<8x128xf32>
    %30 = tpu.matmul %6, %29, %cst_18 {dimension_numbers = #tpu.dot_dimension_numbers<[1], [0], [0], [1], [0, 0, 1, 1], [], []>} : vector<8x128xf32>, vector<128x128xf32>, vector<8x128xf32> -> vector<8x128xf32>
    %c0_19 = arith.constant 0 : index
    %c0_20 = arith.constant 0 : index
    %31 = vector.load %arg6[%c0_19, %c0_20] : memref<1x128xf32, #tpu.memory_space<vmem>>, vector<1x128xf32>
    %32 = vector.broadcast %31 : vector<1x128xf32> to vector<8x128xf32>
    %33 = arith.addf %30, %32 : vector<8x128xf32>
    %34 = arith.mulf %33, %33 : vector<8x128xf32>
    %35 = arith.mulf %33, %34 : vector<8x128xf32>
    %cst_21 = arith.constant 4.471500e-02 : f32
    %36 = vector.broadcast %cst_21 : f32 to vector<8x128xf32>
    %37 = arith.mulf %36, %35 : vector<8x128xf32>
    %38 = arith.addf %33, %37 : vector<8x128xf32>
    %cst_22 = arith.constant 0.797884583 : f32
    %39 = vector.broadcast %cst_22 : f32 to vector<8x128xf32>
    %40 = arith.mulf %39, %38 : vector<8x128xf32>
    %41 = math.tanh %40 : vector<8x128xf32>
    %cst_23 = arith.constant 1.000000e+00 : f32
    %42 = vector.broadcast %cst_23 : f32 to vector<8x128xf32>
    %43 = arith.addf %42, %41 : vector<8x128xf32>
    %cst_24 = arith.constant 5.000000e-01 : f32
    %44 = vector.broadcast %cst_24 : f32 to vector<8x128xf32>
    %45 = arith.mulf %44, %43 : vector<8x128xf32>
    %46 = arith.mulf %33, %45 : vector<8x128xf32>
    %c0_25 = arith.constant 0 : index
    %c0_26 = arith.constant 0 : index
    %47 = vector.load %arg5[%c0_25, %c0_26] : memref<128x128xf32, #tpu.memory_space<vmem>>, vector<128x128xf32>
    %cst_27 = arith.constant dense<0.000000e+00> : vector<8x128xf32>
    %48 = tpu.matmul %11, %47, %cst_27 {dimension_numbers = #tpu.dot_dimension_numbers<[1], [0], [0], [1], [0, 0, 1, 1], [], []>} : vector<8x128xf32>, vector<128x128xf32>, vector<8x128xf32> -> vector<8x128xf32>
    %c0_28 = arith.constant 0 : index
    %c0_29 = arith.constant 0 : index
    %49 = vector.load %arg6[%c0_28, %c0_29] : memref<1x128xf32, #tpu.memory_space<vmem>>, vector<1x128xf32>
    %50 = vector.broadcast %49 : vector<1x128xf32> to vector<8x128xf32>
    %51 = arith.addf %48, %50 : vector<8x128xf32>
    %52 = arith.mulf %51, %51 : vector<8x128xf32>
    %53 = arith.mulf %51, %52 : vector<8x128xf32>
    %cst_30 = arith.constant 4.471500e-02 : f32
    %54 = vector.broadcast %cst_30 : f32 to vector<8x128xf32>
    %55 = arith.mulf %54, %53 : vector<8x128xf32>
    %56 = arith.addf %51, %55 : vector<8x128xf32>
    %cst_31 = arith.constant 0.797884583 : f32
    %57 = vector.broadcast %cst_31 : f32 to vector<8x128xf32>
    %58 = arith.mulf %57, %56 : vector<8x128xf32>
    %59 = math.tanh %58 : vector<8x128xf32>
    %cst_32 = arith.constant 1.000000e+00 : f32
    %60 = vector.broadcast %cst_32 : f32 to vector<8x128xf32>
    %61 = arith.addf %60, %59 : vector<8x128xf32>
    %cst_33 = arith.constant 5.000000e-01 : f32
    %62 = vector.broadcast %cst_33 : f32 to vector<8x128xf32>
    %63 = arith.mulf %62, %61 : vector<8x128xf32>
    %64 = arith.mulf %51, %63 : vector<8x128xf32>
    %65 = arith.mulf %46, %64 : vector<8x128xf32>
    %cst_34 = arith.constant dense<0.000000e+00> : vector<8x128xf32>
    %66 = tpu.matmul %65, %27, %cst_34 {dimension_numbers = #tpu.dot_dimension_numbers<[1], [0], [0], [1], [0, 0, 1, 1], [], []>} : vector<8x128xf32>, vector<128x128xf32>, vector<8x128xf32> -> vector<8x128xf32>
    %67 = arith.mulf %46, %46 : vector<8x128xf32>
    %cst_35 = arith.constant dense<0.000000e+00> : vector<8x128xf32>
    %68 = tpu.matmul %67, %27, %cst_35 {dimension_numbers = #tpu.dot_dimension_numbers<[1], [0], [0], [1], [0, 0, 1, 1], [], []>} : vector<8x128xf32>, vector<128x128xf32>, vector<8x128xf32> -> vector<8x128xf32>
    %69 = arith.mulf %64, %64 : vector<8x128xf32>
    %cst_36 = arith.constant dense<0.000000e+00> : vector<8x128xf32>
    %70 = tpu.matmul %69, %27, %cst_36 {dimension_numbers = #tpu.dot_dimension_numbers<[1], [0], [0], [1], [0, 0, 1, 1], [], []>} : vector<8x128xf32>, vector<128x128xf32>, vector<8x128xf32> -> vector<8x128xf32>
    %71 = arith.mulf %68, %70 : vector<8x128xf32>
    %cst_37 = arith.constant 1.000000e-16 : f32
    %72 = vector.broadcast %cst_37 : f32 to vector<8x128xf32>
    %73 = arith.maximumf %71, %72 : vector<8x128xf32>
    %74 = math.rsqrt %73 : vector<8x128xf32>
    %75 = arith.mulf %66, %74 : vector<8x128xf32>
    %76 = arith.mulf %75, %26 : vector<8x128xf32>
    %77 = vector.shape_cast %76 : vector<8x128xf32> to vector<1x8x128xf32>
    %cst_38 = arith.constant dense<0.000000e+00> : vector<1xf32>
    %78 = vector.multi_reduction <add>, %77, %cst_38 [1, 2] : vector<1x8x128xf32> to vector<1xf32>
    %79 = vector.shape_cast %78 : vector<1xf32> to vector<1x1x1xf32>
    %80 = vector.extract %79[0, 0, 0] : f32 from vector<1x1x1xf32>
    %81 = vector.broadcast %80 : f32 to vector<1x1xf32>
    %82 = arith.addf %28, %81 : vector<1x1xf32>
    %c0_39 = arith.constant 0 : index
    %c0_40 = arith.constant 0 : index
    %83 = vector.load %arg7[%c0_39, %c0_40] : memref<128x128xf32, #tpu.memory_space<vmem>>, vector<128x128xf32>
    %cst_41 = arith.constant dense<0.000000e+00> : vector<8x128xf32>
    %84 = tpu.matmul %46, %83, %cst_41 {dimension_numbers = #tpu.dot_dimension_numbers<[1], [0], [0], [1], [0, 0, 1, 1], [], []>} : vector<8x128xf32>, vector<128x128xf32>, vector<8x128xf32> -> vector<8x128xf32>
    %c0_42 = arith.constant 0 : index
    %c0_43 = arith.constant 0 : index
    %85 = vector.load %arg8[%c0_42, %c0_43] : memref<1x128xf32, #tpu.memory_space<vmem>>, vector<1x128xf32>
    %86 = vector.broadcast %85 : vector<1x128xf32> to vector<8x128xf32>
    %87 = arith.addf %84, %86 : vector<8x128xf32>
    %88 = arith.mulf %87, %87 : vector<8x128xf32>
    %89 = arith.mulf %87, %88 : vector<8x128xf32>
    %cst_44 = arith.constant 4.471500e-02 : f32
    %90 = vector.broadcast %cst_44 : f32 to vector<8x128xf32>
    %91 = arith.mulf %90, %89 : vector<8x128xf32>
    %92 = arith.addf %87, %91 : vector<8x128xf32>
    %cst_45 = arith.constant 0.797884583 : f32
    %93 = vector.broadcast %cst_45 : f32 to vector<8x128xf32>
    %94 = arith.mulf %93, %92 : vector<8x128xf32>
    %95 = math.tanh %94 : vector<8x128xf32>
    %cst_46 = arith.constant 1.000000e+00 : f32
    %96 = vector.broadcast %cst_46 : f32 to vector<8x128xf32>
    %97 = arith.addf %96, %95 : vector<8x128xf32>
    %cst_47 = arith.constant 5.000000e-01 : f32
    %98 = vector.broadcast %cst_47 : f32 to vector<8x128xf32>
    %99 = arith.mulf %98, %97 : vector<8x128xf32>
    %100 = arith.mulf %87, %99 : vector<8x128xf32>
    %c0_48 = arith.constant 0 : index
    %c0_49 = arith.constant 0 : index
    %101 = vector.load %arg7[%c0_48, %c0_49] : memref<128x128xf32, #tpu.memory_space<vmem>>, vector<128x128xf32>
    %cst_50 = arith.constant dense<0.000000e+00> : vector<8x128xf32>
    %102 = tpu.matmul %64, %101, %cst_50 {dimension_numbers = #tpu.dot_dimension_numbers<[1], [0], [0], [1], [0, 0, 1, 1], [], []>} : vector<8x128xf32>, vector<128x128xf32>, vector<8x128xf32> -> vector<8x128xf32>
    %c0_51 = arith.constant 0 : index
    %c0_52 = arith.constant 0 : index
    %103 = vector.load %arg8[%c0_51, %c0_52] : memref<1x128xf32, #tpu.memory_space<vmem>>, vector<1x128xf32>
    %104 = vector.broadcast %103 : vector<1x128xf32> to vector<8x128xf32>
    %105 = arith.addf %102, %104 : vector<8x128xf32>
    %106 = arith.mulf %105, %105 : vector<8x128xf32>
    %107 = arith.mulf %105, %106 : vector<8x128xf32>
    %cst_53 = arith.constant 4.471500e-02 : f32
    %108 = vector.broadcast %cst_53 : f32 to vector<8x128xf32>
    %109 = arith.mulf %108, %107 : vector<8x128xf32>
    %110 = arith.addf %105, %109 : vector<8x128xf32>
    %cst_54 = arith.constant 0.797884583 : f32
    %111 = vector.broadcast %cst_54 : f32 to vector<8x128xf32>
    %112 = arith.mulf %111, %110 : vector<8x128xf32>
    %113 = math.tanh %112 : vector<8x128xf32>
    %cst_55 = arith.constant 1.000000e+00 : f32
    %114 = vector.broadcast %cst_55 : f32 to vector<8x128xf32>
    %115 = arith.addf %114, %113 : vector<8x128xf32>
    %cst_56 = arith.constant 5.000000e-01 : f32
    %116 = vector.broadcast %cst_56 : f32 to vector<8x128xf32>
    %117 = arith.mulf %116, %115 : vector<8x128xf32>
    %118 = arith.mulf %105, %117 : vector<8x128xf32>
    %119 = arith.mulf %100, %118 : vector<8x128xf32>
    %cst_57 = arith.constant dense<0.000000e+00> : vector<8x128xf32>
    %120 = tpu.matmul %119, %27, %cst_57 {dimension_numbers = #tpu.dot_dimension_numbers<[1], [0], [0], [1], [0, 0, 1, 1], [], []>} : vector<8x128xf32>, vector<128x128xf32>, vector<8x128xf32> -> vector<8x128xf32>
    %121 = arith.mulf %100, %100 : vector<8x128xf32>
    %cst_58 = arith.constant dense<0.000000e+00> : vector<8x128xf32>
    %122 = tpu.matmul %121, %27, %cst_58 {dimension_numbers = #tpu.dot_dimension_numbers<[1], [0], [0], [1], [0, 0, 1, 1], [], []>} : vector<8x128xf32>, vector<128x128xf32>, vector<8x128xf32> -> vector<8x128xf32>
    %123 = arith.mulf %118, %118 : vector<8x128xf32>
    %cst_59 = arith.constant dense<0.000000e+00> : vector<8x128xf32>
    %124 = tpu.matmul %123, %27, %cst_59 {dimension_numbers = #tpu.dot_dimension_numbers<[1], [0], [0], [1], [0, 0, 1, 1], [], []>} : vector<8x128xf32>, vector<128x128xf32>, vector<8x128xf32> -> vector<8x128xf32>
    %125 = arith.mulf %122, %124 : vector<8x128xf32>
    %cst_60 = arith.constant 1.000000e-16 : f32
    %126 = vector.broadcast %cst_60 : f32 to vector<8x128xf32>
    %127 = arith.maximumf %125, %126 : vector<8x128xf32>
    %128 = math.rsqrt %127 : vector<8x128xf32>
    %129 = arith.mulf %120, %128 : vector<8x128xf32>
    %130 = arith.mulf %129, %26 : vector<8x128xf32>
    %131 = vector.shape_cast %130 : vector<8x128xf32> to vector<1x8x128xf32>
    %cst_61 = arith.constant dense<0.000000e+00> : vector<1xf32>
    %132 = vector.multi_reduction <add>, %131, %cst_61 [1, 2] : vector<1x8x128xf32> to vector<1xf32>
    %133 = vector.shape_cast %132 : vector<1xf32> to vector<1x1x1xf32>
    %134 = vector.extract %133[0, 0, 0] : f32 from vector<1x1x1xf32>
    %135 = vector.broadcast %134 : f32 to vector<1x1xf32>
    %136 = arith.addf %82, %135 : vector<1x1xf32>
    %c0_62 = arith.constant 0 : index
    %c0_63 = arith.constant 0 : index
    %137 = vector.load %arg9[%c0_62, %c0_63] : memref<128x128xf32, #tpu.memory_space<vmem>>, vector<128x128xf32>
    %cst_64 = arith.constant dense<0.000000e+00> : vector<8x128xf32>
    %138 = tpu.matmul %100, %137, %cst_64 {dimension_numbers = #tpu.dot_dimension_numbers<[1], [0], [0], [1], [0, 0, 1, 1], [], []>} : vector<8x128xf32>, vector<128x128xf32>, vector<8x128xf32> -> vector<8x128xf32>
    %c0_65 = arith.constant 0 : index
    %c0_66 = arith.constant 0 : index
    %139 = vector.load %arg10[%c0_65, %c0_66] : memref<1x128xf32, #tpu.memory_space<vmem>>, vector<1x128xf32>
    %140 = vector.broadcast %139 : vector<1x128xf32> to vector<8x128xf32>
    %141 = arith.addf %138, %140 : vector<8x128xf32>
    %142 = arith.mulf %141, %141 : vector<8x128xf32>
    %143 = arith.mulf %141, %142 : vector<8x128xf32>
    %cst_67 = arith.constant 4.471500e-02 : f32
    %144 = vector.broadcast %cst_67 : f32 to vector<8x128xf32>
    %145 = arith.mulf %144, %143 : vector<8x128xf32>
    %146 = arith.addf %141, %145 : vector<8x128xf32>
    %cst_68 = arith.constant 0.797884583 : f32
    %147 = vector.broadcast %cst_68 : f32 to vector<8x128xf32>
    %148 = arith.mulf %147, %146 : vector<8x128xf32>
    %149 = math.tanh %148 : vector<8x128xf32>
    %cst_69 = arith.constant 1.000000e+00 : f32
    %150 = vector.broadcast %cst_69 : f32 to vector<8x128xf32>
    %151 = arith.addf %150, %149 : vector<8x128xf32>
    %cst_70 = arith.constant 5.000000e-01 : f32
    %152 = vector.broadcast %cst_70 : f32 to vector<8x128xf32>
    %153 = arith.mulf %152, %151 : vector<8x128xf32>
    %154 = arith.mulf %141, %153 : vector<8x128xf32>
    %c0_71 = arith.constant 0 : index
    %c0_72 = arith.constant 0 : index
    %155 = vector.load %arg9[%c0_71, %c0_72] : memref<128x128xf32, #tpu.memory_space<vmem>>, vector<128x128xf32>
    %cst_73 = arith.constant dense<0.000000e+00> : vector<8x128xf32>
    %156 = tpu.matmul %118, %155, %cst_73 {dimension_numbers = #tpu.dot_dimension_numbers<[1], [0], [0], [1], [0, 0, 1, 1], [], []>} : vector<8x128xf32>, vector<128x128xf32>, vector<8x128xf32> -> vector<8x128xf32>
    %c0_74 = arith.constant 0 : index
    %c0_75 = arith.constant 0 : index
    %157 = vector.load %arg10[%c0_74, %c0_75] : memref<1x128xf32, #tpu.memory_space<vmem>>, vector<1x128xf32>
    %158 = vector.broadcast %157 : vector<1x128xf32> to vector<8x128xf32>
    %159 = arith.addf %156, %158 : vector<8x128xf32>
    %160 = arith.mulf %159, %159 : vector<8x128xf32>
    %161 = arith.mulf %159, %160 : vector<8x128xf32>
    %cst_76 = arith.constant 4.471500e-02 : f32
    %162 = vector.broadcast %cst_76 : f32 to vector<8x128xf32>
    %163 = arith.mulf %162, %161 : vector<8x128xf32>
    %164 = arith.addf %159, %163 : vector<8x128xf32>
    %cst_77 = arith.constant 0.797884583 : f32
    %165 = vector.broadcast %cst_77 : f32 to vector<8x128xf32>
    %166 = arith.mulf %165, %164 : vector<8x128xf32>
    %167 = math.tanh %166 : vector<8x128xf32>
    %cst_78 = arith.constant 1.000000e+00 : f32
    %168 = vector.broadcast %cst_78 : f32 to vector<8x128xf32>
    %169 = arith.addf %168, %167 : vector<8x128xf32>
    %cst_79 = arith.constant 5.000000e-01 : f32
    %170 = vector.broadcast %cst_79 : f32 to vector<8x128xf32>
    %171 = arith.mulf %170, %169 : vector<8x128xf32>
    %172 = arith.mulf %159, %171 : vector<8x128xf32>
    %173 = arith.mulf %154, %172 : vector<8x128xf32>
    %cst_80 = arith.constant dense<0.000000e+00> : vector<8x128xf32>
    %174 = tpu.matmul %173, %27, %cst_80 {dimension_numbers = #tpu.dot_dimension_numbers<[1], [0], [0], [1], [0, 0, 1, 1], [], []>} : vector<8x128xf32>, vector<128x128xf32>, vector<8x128xf32> -> vector<8x128xf32>
    %175 = arith.mulf %154, %154 : vector<8x128xf32>
    %cst_81 = arith.constant dense<0.000000e+00> : vector<8x128xf32>
    %176 = tpu.matmul %175, %27, %cst_81 {dimension_numbers = #tpu.dot_dimension_numbers<[1], [0], [0], [1], [0, 0, 1, 1], [], []>} : vector<8x128xf32>, vector<128x128xf32>, vector<8x128xf32> -> vector<8x128xf32>
    %177 = arith.mulf %172, %172 : vector<8x128xf32>
    %cst_82 = arith.constant dense<0.000000e+00> : vector<8x128xf32>
    %178 = tpu.matmul %177, %27, %cst_82 {dimension_numbers = #tpu.dot_dimension_numbers<[1], [0], [0], [1], [0, 0, 1, 1], [], []>} : vector<8x128xf32>, vector<128x128xf32>, vector<8x128xf32> -> vector<8x128xf32>
    %179 = arith.mulf %176, %178 : vector<8x128xf32>
    %cst_83 = arith.constant 1.000000e-16 : f32
    %180 = vector.broadcast %cst_83 : f32 to vector<8x128xf32>
    %181 = arith.maximumf %179, %180 : vector<8x128xf32>
    %182 = math.rsqrt %181 : vector<8x128xf32>
    %183 = arith.mulf %174, %182 : vector<8x128xf32>
    %184 = arith.mulf %183, %26 : vector<8x128xf32>
    %185 = vector.shape_cast %184 : vector<8x128xf32> to vector<1x8x128xf32>
    %cst_84 = arith.constant dense<0.000000e+00> : vector<1xf32>
    %186 = vector.multi_reduction <add>, %185, %cst_84 [1, 2] : vector<1x8x128xf32> to vector<1xf32>
    %187 = vector.shape_cast %186 : vector<1xf32> to vector<1x1x1xf32>
    %188 = vector.extract %187[0, 0, 0] : f32 from vector<1x1x1xf32>
    %189 = vector.broadcast %188 : f32 to vector<1x1xf32>
    %190 = arith.addf %136, %189 : vector<1x1xf32>
    %191 = vector.shape_cast %190 : vector<1x1xf32> to vector<1x1x1xf32>
    %192 = vector.shape_cast %191 : vector<1x1x1xf32> to vector<1x1x1xf32>
    %193 = vector.broadcast %192 : vector<1x1x1xf32> to vector<1x8x128xf32>
    %c0_85 = arith.constant 0 : index
    %c0_86 = arith.constant 0 : index
    %c0_87 = arith.constant 0 : index
    %194 = vector.load %arg12[%c0_85, %c0_86, %c0_87] : memref<1x8x128xf32, #tpu.memory_space<vmem>>, vector<1x8x128xf32>
    tpu.vector_store %arg12[%c0_85, %c0_86, %c0_87], %193 {strides = array<i32>} : memref<1x8x128xf32, #tpu.memory_space<vmem>>, vector<1x8x128xf32>,
    return
  }
  func.func @transform_0(%arg0: i32) -> (i32, i32) {
    %c0_i32 = arith.constant 0 : i32
    %c0_i32_0 = arith.constant 0 : i32
    return %arg0, %c0_i32 : i32, i32
  }
  func.func @transform_1(%arg0: i32) -> (i32, i32) {
    %c0_i32 = arith.constant 0 : i32
    %c0_i32_0 = arith.constant 0 : i32
    return %arg0, %c0_i32 : i32, i32
  }
  func.func @transform_2(%arg0: i32) -> (i32, i32) {
    %c0_i32 = arith.constant 0 : i32
    %c0_i32_0 = arith.constant 0 : i32
    %c0_i32_1 = arith.constant 0 : i32
    return %c0_i32, %c0_i32_0 : i32, i32
  }
  func.func @transform_3(%arg0: i32) -> (i32, i32) {
    %c0_i32 = arith.constant 0 : i32
    %c0_i32_0 = arith.constant 0 : i32
    %c0_i32_1 = arith.constant 0 : i32
    return %c0_i32, %c0_i32_0 : i32, i32
  }
  func.func @transform_4(%arg0: i32) -> (i32, i32) {
    %c0_i32 = arith.constant 0 : i32
    %c0_i32_0 = arith.constant 0 : i32
    %c0_i32_1 = arith.constant 0 : i32
    return %c0_i32, %c0_i32_0 : i32, i32
  }
  func.func @transform_5(%arg0: i32) -> (i32, i32) {
    %c0_i32 = arith.constant 0 : i32
    %c0_i32_0 = arith.constant 0 : i32
    %c0_i32_1 = arith.constant 0 : i32
    return %c0_i32, %c0_i32_0 : i32, i32
  }
  func.func @transform_6(%arg0: i32) -> (i32, i32) {
    %c0_i32 = arith.constant 0 : i32
    %c0_i32_0 = arith.constant 0 : i32
    %c0_i32_1 = arith.constant 0 : i32
    return %c0_i32, %c0_i32_0 : i32, i32
  }
  func.func @transform_7(%arg0: i32) -> (i32, i32) {
    %c0_i32 = arith.constant 0 : i32
    %c0_i32_0 = arith.constant 0 : i32
    %c0_i32_1 = arith.constant 0 : i32
    return %c0_i32, %c0_i32_0 : i32, i32
  }
  func.func @transform_8(%arg0: i32) -> (i32, i32) {
    %c0_i32 = arith.constant 0 : i32
    %c0_i32_0 = arith.constant 0 : i32
    %c0_i32_1 = arith.constant 0 : i32
    return %c0_i32, %c0_i32_0 : i32, i32
  }
  func.func @transform_9(%arg0: i32) -> (i32, i32) {
    %c0_i32 = arith.constant 0 : i32
    %c0_i32_0 = arith.constant 0 : i32
    %c0_i32_1 = arith.constant 0 : i32
    return %c0_i32, %c0_i32_0 : i32, i32
  }
  func.func @transform_10(%arg0: i32) -> (i32, i32) {
    %c0_i32 = arith.constant 0 : i32
    %c0_i32_0 = arith.constant 0 : i32
    %c0_i32_1 = arith.constant 0 : i32
    return %c0_i32, %c0_i32_0 : i32, i32
  }
  func.func @transform_11(%arg0: i32) -> (i32, i32, i32) {
    %c0_i32 = arith.constant 0 : i32
    %c0_i32_0 = arith.constant 0 : i32
    %c0_i32_1 = arith.constant 0 : i32
    return %arg0, %c0_i32, %c0_i32_0 : i32, i32, i32
  }
}

</mosaic_0001>

<bundles_post_ra>
// kernel: tpu_custom_call.1
= control target key start
LH: loop header
LB: loop body
LE: loop exit
PB: predicated region body
PF: predicated region fallthrough
CT: control target
= control target key end

     0   :  { %16 = vsyncpa [#allocation3], 0  ;;  %s3572_s0 = inlined_call_operand.hbm [shape: f32[8,256], index: 0, kind: input, shape index: {}]   ;;  %s3573_s1 = inlined_call_operand.hbm [shape: f32[8,256], index: 1, kind: input, shape index: {}]   ;;  %s3574_s2 = inlined_call_operand.hbm [shape: f32[256,128], index: 2, kind: input, shape index: {}]   ;;  %s3575_s3 = inlined_call_operand.vmem [shape: f32[1,128], index: 3, kind: input, shape index: {}]   ;;  %s3576_s4 = inlined_call_operand.hbm [shape: f32[128,128], index: 4, kind: input, shape index: {}]   ;;  %s3577_s5 = inlined_call_operand.vmem [shape: f32[1,128], index: 5, kind: input, shape index: {}]   ;;  %s3578_s6 = inlined_call_operand.hbm [shape: f32[128,128], index: 6, kind: input, shape index: {}]   ;;  %s3579_s7 = inlined_call_operand.vmem [shape: f32[1,128], index: 7, kind: input, shape index: {}]   ;;  %s3580_s8 = inlined_call_operand.hbm [shape: f32[128,128], index: 8, kind: input, shape index: {}]   ;;  %s3581_s9 = inlined_call_operand.vmem [shape: f32[1,128], index: 9, kind: input, shape index: {}]   ;;  %s3582_s10 = inlined_call_operand.hbm [shape: f32[128,128], index: 10, kind: input, shape index: {}]   ;;  %s3583_s11 = inlined_call_operand.hbm [shape: f32[1,8,128], index: 11, kind: output, shape index: {}]  }
   0x1   :  { %17 = vsyncpa [#allocation6], 0 }
   0x2   :  { %18 = vsyncpa [#allocation9], 0 }
   0x3   :  { %19 = vsyncpa [#allocation12], 0 }
   0x4   :  { %20 = vsyncpa [#allocation4], 0  ;;  %s3094_s17 = smov [#allocation5]   ;;  %s2908_s21 = scalar_lea.hbm %s3573_s1, 256 }
   0x5   :  { %s37_s18 = sshll.u32 %s3094_s17, 4  ;;  %p2909_p0 = scmp.ne.s32.totalorder %s3573_s1, %s2908_s21  ;;  %s38_s18 = int_to_ptr.vmem [resolvable:$true] %s37_s18 }
   0x6   :  { %p2912_p1 = scmp.lt.u32.totalorder %s2908_s21, %s3573_s1 }
   0x8   :  { %p2914_p2 = pnand %p2912_p1, %p2909_p0 }
   0xa   :  { %2917 = shalt.err (!%p2914_p2)
}
   0xb   :  { %s2918_s26 = scalar_lea.vmem %s38_s18, 256  ;;  %p2923_p4 = scmp.lt.s32.totalorder %s38_s18, %s38_s18 }
   0xc   :  { %p2919_p3 = scmp.ne.s32.totalorder %s38_s18, %s2918_s26  ;;  %p2924_p5 = scmp.lt.s32.totalorder %s2918_s26, %s2918_s26 }
   0xe   :  { %p2925_p6 = por %p2924_p5, %p2923_p4 }
  0x10   :  { %p2926_p7 = pnand %p2925_p6, %p2919_p3 }
  0x12   :  { %2929 = shalt.err (!%p2926_p7)
}
  0x13   :  { %40 = dma.hbm_to_vmem [thread:$0]  %s3573_s1, 256, %s38_s18, [#allocation6]  }
  0x14   :  { %s3095_s29 = smov [#allocation8]   ;;  %s3096_s12 = smov [#allocation11]  }
  0x15   :  { %s60_s30 = sshll.u32 %s3095_s29, 4  ;;  %s88_s13 = sshll.u32 %s3096_s12, 4  ;;  %s61_s30 = int_to_ptr.vmem [resolvable:$true] %s60_s30  ;;  %s89_s13 = int_to_ptr.vmem [resolvable:$true] %s88_s13 }
  0x16   :  { %s2930_s16 = scalar_lea.hbm %s3576_s4, 2048 }
  0x17   :  { %p2931_p8 = scmp.ne.s32.totalorder %s3576_s4, %s2930_s16  ;;  %p2934_p9 = scmp.lt.u32.totalorder %s2930_s16, %s3576_s4 }
  0x19   :  { %p2936_p10 = pnand %p2934_p9, %p2931_p8 }
  0x1b   :  { %2939 = shalt.err (!%p2936_p10)
}
  0x1c   :  { %s2940_s1 = scalar_lea.vmem %s61_s30, 2048  ;;  %p2945_p12 = scmp.lt.s32.totalorder %s61_s30, %s61_s30 }
  0x1d   :  { %p2941_p11 = scmp.ne.s32.totalorder %s61_s30, %s2940_s1  ;;  %p2946_p13 = scmp.lt.s32.totalorder %s2940_s1, %s2940_s1 }
  0x1f   :  { %p2947_p0 = por %p2946_p13, %p2945_p12 }
  0x21   :  { %p2948_p1 = pnand %p2947_p0, %p2941_p11 }
  0x23   :  { %2951 = shalt.err (!%p2948_p1)
}
  0x24   :  { %s3097_s18 = smov 128   ;;  %s3098_s22 = smov 8  }
  0x25   :  { %66 = dma.hbm_to_vmem [thread:$0]  %s3576_s4, 2048, %s61_s30, [#allocation9], %s3097_s18, %s3097_s18, %s3098_s22  }
  0x26   :  { %s2952_s27 = scalar_lea.hbm %s3580_s8, 2048 }
  0x27   :  { %p2953_p2 = scmp.ne.s32.totalorder %s3580_s8, %s2952_s27  ;;  %p2956_p3 = scmp.lt.u32.totalorder %s2952_s27, %s3580_s8 }
  0x29   :  { %p2958_p4 = pnand %p2956_p3, %p2953_p2 }
  0x2b   :  { %2961 = shalt.err (!%p2958_p4)
}
  0x2c   :  { %s2962_s15 = scalar_lea.vmem %s89_s13, 2048  ;;  %p2967_p6 = scmp.lt.s32.totalorder %s89_s13, %s89_s13 }
  0x2d   :  { %p2963_p5 = scmp.ne.s32.totalorder %s89_s13, %s2962_s15  ;;  %p2968_p7 = scmp.lt.s32.totalorder %s2962_s15, %s2962_s15 }
  0x2f   :  { %p2969_p8 = por %p2968_p7, %p2967_p6 }
  0x31   :  { %p2970_p9 = pnand %p2969_p8, %p2963_p5 }
  0x33   :  { %2973 = shalt.err (!%p2970_p9)
}
  0x34   :  { %94 = dma.hbm_to_vmem [thread:$0]  %s3580_s8, 2048, %s89_s13, [#allocation12], %s3097_s18, %s3097_s18, %s3098_s22  }
  0x35   :  { %s3099_s16 = smov [#allocation2]   ;;  %s3100_s19 = smov [#allocation7]  }
  0x36   :  { %s27_s17 = sshll.u32 %s3099_s16, 4  ;;  %s46_s20 = sshll.u32 %s3100_s19, 4  ;;  %s28_s17 = int_to_ptr.vmem [resolvable:$true] %s27_s17  ;;  %s47_s20 = int_to_ptr.vmem [resolvable:$true] %s46_s20 }
  0x37   :  { %s2974_s23 = scalar_lea.hbm %s3572_s0, 256 }
  0x38   :  { %p2975_p10 = scmp.ne.s32.totalorder %s3572_s0, %s2974_s23  ;;  %p2978_p11 = scmp.lt.u32.totalorder %s2974_s23, %s3572_s0 }
  0x3a   :  { %p2980_p12 = pnand %p2978_p11, %p2975_p10 }
  0x3c   :  { %2983 = shalt.err (!%p2980_p12)
}
  0x3d   :  { %s2984_s8 = scalar_lea.vmem %s28_s17, 256  ;;  %p2989_p0 = scmp.lt.s32.totalorder %s28_s17, %s28_s17 }
  0x3e   :  { %p2985_p13 = scmp.ne.s32.totalorder %s28_s17, %s2984_s8  ;;  %p2990_p1 = scmp.lt.s32.totalorder %s2984_s8, %s2984_s8 }
  0x40   :  { %p2991_p2 = por %p2990_p1, %p2989_p0 }
  0x42   :  { %p2992_p3 = pnand %p2991_p2, %p2985_p13 }
  0x44   :  { %2995 = shalt.err (!%p2992_p3)
}
  0x45   :  { %30 = dma.hbm_to_vmem [thread:$0]  %s3572_s0, 256, %s28_s17, [#allocation3]  }
  0x46   :  { %s2996_s14 = scalar_lea.hbm %s3574_s2, 4096 }
  0x47   :  { %p2997_p4 = scmp.ne.s32.totalorder %s3574_s2, %s2996_s14  ;;  %p3000_p5 = scmp.lt.u32.totalorder %s2996_s14, %s3574_s2 }
  0x49   :  { %p3002_p6 = pnand %p3000_p5, %p2997_p4 }
  0x4b   :  { %3005 = shalt.err (!%p3002_p6)
}
  0x4c   :  { %s3006_s19 = scalar_lea.vmem %s47_s20, 4096  ;;  %p3011_p8 = scmp.lt.s32.totalorder %s47_s20, %s47_s20 }
  0x4d   :  { %p3007_p7 = scmp.ne.s32.totalorder %s47_s20, %s3006_s19  ;;  %p3012_p9 = scmp.lt.s32.totalorder %s3006_s19, %s3006_s19 }
  0x4f   :  { %p3013_p10 = por %p3012_p9, %p3011_p8 }
  0x51   :  { %p3014_p11 = pnand %p3013_p10, %p3007_p7 }
  0x53   :  { %3017 = shalt.err (!%p3014_p11)
}
  0x54   :  { %52 = dma.hbm_to_vmem [thread:$0]  %s3574_s2, 4096, %s47_s20, [#allocation6], %s3097_s18, %s3097_s18, %s3098_s22  }
  0x55   :  { %s3101_s21 = smov [#allocation10]   ;;  %s3102_s23 = smov [#allocation13]  }
  0x56   :  { %s74_s1 = sshll.u32 %s3101_s21, 4  ;;  %s102_s24 = sshll.u32 %s3102_s23, 4  ;;  %s75_s1 = int_to_ptr.vmem [resolvable:$true] %s74_s1  ;;  %s103_s24 = int_to_ptr.vmem [resolvable:$true] %s102_s24 }
  0x57   :  { %s3018_s27 = scalar_lea.hbm %s3578_s6, 2048 }
  0x58   :  { %p3019_p12 = scmp.ne.s32.totalorder %s3578_s6, %s3018_s27  ;;  %p3022_p13 = scmp.lt.u32.totalorder %s3018_s27, %s3578_s6 }
  0x5a   :  { %p3024_p0 = pnand %p3022_p13, %p3019_p12 }
  0x5c   :  { %3027 = shalt.err (!%p3024_p0)
}
  0x5d   :  { %s3028_s2 = scalar_lea.vmem %s75_s1, 2048  ;;  %p3033_p2 = scmp.lt.s32.totalorder %s75_s1, %s75_s1 }
  0x5e   :  { %p3029_p1 = scmp.ne.s32.totalorder %s75_s1, %s3028_s2  ;;  %p3034_p3 = scmp.lt.s32.totalorder %s3028_s2, %s3028_s2 }
  0x60   :  { %p3035_p4 = por %p3034_p3, %p3033_p2 }
  0x62   :  { %p3036_p5 = pnand %p3035_p4, %p3029_p1 }
  0x64   :  { %3039 = shalt.err (!%p3036_p5)
}
  0x65   :  { %80 = dma.hbm_to_vmem [thread:$0]  %s3578_s6, 2048, %s75_s1, [#allocation9], %s3097_s18, %s3097_s18, %s3098_s22  }
  0x66   :  { %s3040_s4 = scalar_lea.hbm %s3582_s10, 2048 }
  0x67   :  { %p3041_p6 = scmp.ne.s32.totalorder %s3582_s10, %s3040_s4  ;;  %p3044_p7 = scmp.lt.u32.totalorder %s3040_s4, %s3582_s10 }
  0x69   :  { %p3046_p8 = pnand %p3044_p7, %p3041_p6 }
  0x6b   :  { %3049 = shalt.err (!%p3046_p8)
}
  0x6c   :  { %s3050_s17 = scalar_lea.vmem %s103_s24, 2048  ;;  %p3055_p10 = scmp.lt.s32.totalorder %s103_s24, %s103_s24 }
  0x6d   :  { %p3051_p9 = scmp.ne.s32.totalorder %s103_s24, %s3050_s17  ;;  %p3056_p11 = scmp.lt.s32.totalorder %s3050_s17, %s3050_s17 }
  0x6f   :  { %p3057_p12 = por %p3056_p11, %p3055_p10 }
  0x71   :  { %p3058_p13 = pnand %p3057_p12, %p3051_p9 }
  0x73   :  { %3061 = shalt.err (!%p3058_p13)
}
  0x74   :  { %108 = dma.hbm_to_vmem [thread:$0]  %s3582_s10, 2048, %s103_s24, [#allocation12], %s3097_s18, %s3097_s18, %s3098_s22  }
  0x75   :  { %3084 = dma.done.wait [#allocation3], 256  }
  0x76   :  { %3085 = vsyncadd [#allocation3], 4294967040 }
  0x77   :  { %3086 = dma.done.wait [#allocation6], 4352  }
  0x78   :  { %3087 = vsyncadd [#allocation6], 4294962944 }
  0x79   :  { %3088 = dma.done.wait [#allocation9], 4096  }
  0x7a   :  { %3089 = vsyncadd [#allocation9], 4294963200 }
  0x7b   :  { %3090 = dma.done.wait [#allocation12], 4096  }
  0x7c   :  { %3091 = vsyncadd [#allocation12], 4294963200  ;;  %v150_v0 = vld [vmem:[#allocation7 + $0x80] sm:$0xff]  ;;  %v151_v1 = vld [vmem:[#allocation7 + $0x88] sm:$0xff]  ;;  %v3103_v55 = vmov 0.0|0.0   ;;  %vm3104_vm0 = vmmov 0  }
  0x7d   :  { %v134_v2 = vld [vmem:[#allocation7] sm:$0xff]  ;;  %v2447_v3 = vpack.c.bf16 %v151_v1, %v150_v0  ;;  %v135_v4 = vld [vmem:[#allocation7 + $0x8] sm:$0xff]  ;;  %v152_v5 = vld [vmem:[#allocation7 + $0x90] sm:$0xff]  ;;  %s3106_s25 = smov [#allocation14]  }
  0x7e   :  { %v153_v6 = vld [vmem:[#allocation7 + $0x98] sm:$0xff]  ;;  %v2449_v7 = vpack.c.bf16 %v135_v4, %v134_v2  ;;  %v136_v9 = vld [vmem:[#allocation7 + $0x10] sm:$0xff]  ;;  %v154_v11 = vld [vmem:[#allocation7 + $0xa0] sm:$0xff]  ;;  %s1580_s26 = sshll.u32 %s3106_s25, 4  ;;  %s1581_s26 = int_to_ptr.vmem [resolvable:$true] %s1580_s26 }
  0x7f   :  { %v2451_v8 = vpack.c.bf16 %v153_v6, %v152_v5  ;;  %v137_v10 = vld [vmem:[#allocation7 + $0x18] sm:$0xff]  ;;  %2448 = vmatprep.subr.bf16.mxu0 %v2447_v3  ;;  %2480 = vmatprep.subr.bf16.mxu1 %v2447_v3  ;;  %v155_v12 = vld [vmem:[#allocation7 + $0xa8] sm:$0xff]  ;;  %v138_v15 = vld [vmem:[#allocation7 + $0x20] sm:$0xff]  ;;  %s3062_s8 = scalar_lea.vmem %s1581_s26, 128  ;;  %p3067_p1 = scmp.lt.s32.totalorder %s1581_s26, %s1581_s26 }
  0x80   :  { %2450 = vmatpush3.bf16.msra.mxu0 %v2449_v7  ;;  %2482 = vmatpush3.bf16.msra.mxu1 %v2449_v7  ;;  %v2453_v13 = vpack.c.bf16 %v137_v10, %v136_v9  ;;  %v2455_v14 = vpack.c.bf16 %v155_v12, %v154_v11  ;;  %v139_v16 = vld [vmem:[#allocation7 + $0x28] sm:$0xff]  ;;  %v156_v17 = vld [vmem:[#allocation7 + $0xb0] sm:$0xff]  ;;  %v157_v18 = vld [vmem:[#allocation7 + $0xb8] sm:$0xff]  ;;  %p3063_p0 = scmp.ne.s32.totalorder %s1581_s26, %s3062_s8  ;;  %p3068_p2 = scmp.lt.s32.totalorder %s3062_s8, %s3062_s8 }
  0x81   :  { %2452 = vmatprep.subr.bf16.mxu0 %v2451_v8  ;;  %2484 = vmatprep.subr.bf16.mxu1 %v2451_v8  ;;  %v2457_v19 = vpack.c.bf16 %v139_v16, %v138_v15  ;;  %v2459_v20 = vpack.c.bf16 %v157_v18, %v156_v17  ;;  %v140_v21 = vld [vmem:[#allocation7 + $0x30] sm:$0xff]  ;;  %v141_v22 = vld [vmem:[#allocation7 + $0x38] sm:$0xff]  ;;  %v158_v23 = vld [vmem:[#allocation7 + $0xc0] sm:$0xff] }
  0x82   :  { %v159_v24 = vld [vmem:[#allocation7 + $0xc8] sm:$0xff]  ;;  %v133_v26 = vld [vmem:[#allocation5 + $0x8] sm:$0xff]  ;;  %v2461_v27 = vpack.c.bf16 %v141_v22, %v140_v21  ;;  %v142_v29 = vld [vmem:[#allocation7 + $0x40] sm:$0xff]  ;;  %p3069_p3 = por %p3068_p2, %p3067_p1 }
  0x83   :  { %v131_v25 = vld [vmem:[#allocation2 + $0x8] sm:$0xff]  ;;  %v2463_v28 = vpack.c.bf16 %v159_v24, %v158_v23  ;;  %v160_v31 = vld [vmem:[#allocation7 + $0xd0] sm:$0xff]  ;;  %v161_v32 = vld [vmem:[#allocation7 + $0xd8] sm:$0xff]  ;;  %307 = vmatprep.mubr.f32.mxu1 %v133_v26 }
  0x84   :  { %2454 = vmatpush3.bf16.msra.mxu0 %v2453_v13  ;;  %2486 = vmatpush3.bf16.msra.mxu1 %v2453_v13  ;;  %v143_v30 = vld [vmem:[#allocation7 + $0x48] sm:$0xff]  ;;  %v2467_v34 = vpack.c.bf16 %v161_v32, %v160_v31  ;;  %v144_v35 = vld [vmem:[#allocation7 + $0x50] sm:$0xff]  ;;  %v145_v36 = vld [vmem:[#allocation7 + $0x58] sm:$0xff]  ;;  %v3105_v13 = vmov 0.0   ;;  %p3070_p4 = pnand %p3069_p3, %p3063_p0 }
  0x85   :  { %2456 = vmatprep.subr.bf16.mxu0 %v2455_v14  ;;  %2488 = vmatprep.subr.bf16.mxu1 %v2455_v14  ;;  %v2465_v33 = vpack.c.bf16 %v143_v30, %v142_v29  ;;  %v162_v37 = vld [vmem:[#allocation7 + $0xe0] sm:$0xff]  ;;  %v163_v38 = vld [vmem:[#allocation7 + $0xe8] sm:$0xff]  ;;  %v2469_v39 = vpack.c.bf16 %v145_v36, %v144_v35  ;;  %v164_v43 = vld [vmem:[#allocation7 + $0xf0] sm:$0xff] }
  0x86   :  { %237 = vmatprep.mubr.f32.mxu0 %v131_v25  ;;  %v2471_v40 = vpack.c.bf16 %v163_v38, %v162_v37  ;;  %v146_v41 = vld [vmem:[#allocation7 + $0x60] sm:$0xff]  ;;  %v147_v42 = vld [vmem:[#allocation7 + $0x68] sm:$0xff]  ;;  %v165_v44 = vld [vmem:[#allocation7 + $0xf8] sm:$0xff] }
  0x87   :  { %v2473_v45 = vpack.c.bf16 %v147_v42, %v146_v41  ;;  %v2475_v46 = vpack.c.bf16 %v165_v44, %v164_v43  ;;  %v148_v47 = vld [vmem:[#allocation7 + $0x70] sm:$0xff]  ;;  %v149_v48 = vld [vmem:[#allocation7 + $0x78] sm:$0xff]  ;;  %v343_v50 = vld [vmem:[#allocation8] sm:$0xff] }
  0x88   :  { %2458 = vmatpush3.bf16.msra.mxu0 %v2457_v19  ;;  %2490 = vmatpush3.bf16.msra.mxu1 %v2457_v19  ;;  %v2477_v49 = vpack.c.bf16 %v149_v48, %v148_v47  ;;  %v344_v51 = vld [vmem:[#allocation8 + $0x8] sm:$0xff]  ;;  %v130_v52 = vld [vmem:[#allocation2] sm:$0xff]  ;;  %v132_v53 = vld [vmem:[#allocation5] sm:$0xff] }
  0x89   :  { %2460 = vmatprep.subr.bf16.mxu0 %v2459_v20  ;;  %2492 = vmatprep.subr.bf16.mxu1 %v2459_v20  ;;  %v2512_v54 = vpack.c.bf16 %v344_v51, %v343_v50  ;;  %v345_v56 = vld [vmem:[#allocation8 + $0x10] sm:$0xff]  ;;  %v346_v57 = vld [vmem:[#allocation8 + $0x18] sm:$0xff]  ;;  %v347_v59 = vld [vmem:[#allocation8 + $0x20] sm:$0xff] }
  0x8a   :  { %v2515_v58 = vpack.c.bf16 %v346_v57, %v345_v56  ;;  %v348_v60 = vld [vmem:[#allocation8 + $0x28] sm:$0xff]  ;;  %v349_v62 = vld [vmem:[#allocation8 + $0x30] sm:$0xff]  ;;  %v350_v63 = vld [vmem:[#allocation8 + $0x38] sm:$0xff] }
  0x8b   :  { %v2518_v61 = vpack.c.bf16 %v348_v60, %v347_v59  ;;  %v2521_v0 = vpack.c.bf16 %v350_v63, %v349_v62  ;;  %v351_v1 = vld [vmem:[#allocation8 + $0x40] sm:$0xff]  ;;  %v352_v2 = vld [vmem:[#allocation8 + $0x48] sm:$0xff]  ;;  %v353_v4 = vld [vmem:[#allocation8 + $0x50] sm:$0xff] }
  0x8c   :  { %2462 = vmatpush3.bf16.msra.mxu0 %v2461_v27  ;;  %2494 = vmatpush3.bf16.msra.mxu1 %v2461_v27  ;;  %v2524_v3 = vpack.c.bf16 %v352_v2, %v351_v1  ;;  %v354_v5 = vld [vmem:[#allocation8 + $0x58] sm:$0xff]  ;;  %v355_v7 = vld [vmem:[#allocation8 + $0x60] sm:$0xff]  ;;  %v356_v8 = vld [vmem:[#allocation8 + $0x68] sm:$0xff] }
  0x8d   :  { %2464 = vmatprep.subr.bf16.mxu0 %v2463_v28  ;;  %2496 = vmatprep.subr.bf16.mxu1 %v2463_v28  ;;  %v2527_v6 = vpack.c.bf16 %v354_v5, %v353_v4  ;;  %v2530_v9 = vpack.c.bf16 %v356_v8, %v355_v7  ;;  %v357_v10 = vld [vmem:[#allocation8 + $0x70] sm:$0xff]  ;;  %v358_v11 = vld [vmem:[#allocation8 + $0x78] sm:$0xff]  ;;  %v1592_v16 = vld [vmem:[%s3575_s3] ss:$0 sm:$0xff] }
  0x8e   :  { %v2533_v12 = vpack.c.bf16 %v358_v11, %v357_v10  ;;  %v327_v23 = vld [vmem:[#allocation13] sm:$0xff]  ;;  %v328_v24 = vld [vmem:[#allocation13 + $0x8] sm:$0xff]  ;;  %v329_v26 = vld [vmem:[#allocation13 + $0x10] sm:$0xff] }
  0x8f   :  { %v3295_v25 = vpack.c.bf16 %v328_v24, %v327_v23  ;;  %v330_v27 = vld [vmem:[#allocation13 + $0x18] sm:$0xff]  ;;  %v331_v29 = vld [vmem:[#allocation13 + $0x20] sm:$0xff]  ;;  %v332_v30 = vld [vmem:[#allocation13 + $0x28] sm:$0xff] }
  0x90   :  { %2466 = vmatpush3.bf16.msra.mxu0 %v2465_v33  ;;  %2498 = vmatpush3.bf16.msra.mxu1 %v2465_v33  ;;  %v3301_v28 = vpack.c.bf16 %v330_v27, %v329_v26  ;;  %v3307_v31 = vpack.c.bf16 %v332_v30, %v331_v29  ;;  %v333_v32 = vld [vmem:[#allocation13 + $0x30] sm:$0xff]  ;;  %v334_v33 = vld [vmem:[#allocation13 + $0x38] sm:$0xff]  ;;  %v335_v35 = vld [vmem:[#allocation13 + $0x40] sm:$0xff] }
  0x91   :  { %2468 = vmatprep.subr.bf16.mxu0 %v2467_v34  ;;  %2500 = vmatprep.subr.bf16.mxu1 %v2467_v34  ;;  %v3313_v34 = vpack.c.bf16 %v334_v33, %v333_v32  ;;  %v336_v36 = vld [vmem:[#allocation13 + $0x48] sm:$0xff]  ;;  %v337_v38 = vld [vmem:[#allocation13 + $0x50] sm:$0xff]  ;;  %v339_v41 = vld [vmem:[#allocation13 + $0x60] sm:$0xff] }
  0x92   :  { %v3319_v37 = vpack.c.bf16 %v336_v36, %v335_v35  ;;  %v340_v42 = vld [vmem:[#allocation13 + $0x68] sm:$0xff]  ;;  %v341_v44 = vld [vmem:[#allocation13 + $0x70] sm:$0xff]  ;;  %v1594_v47 = vld [vmem:[%s3577_s5] ss:$0 sm:$0xff] }
  0x93   :  { %v3331_v43 = vpack.c.bf16 %v340_v42, %v339_v41  ;;  %v754_v7 = vld [vmem:[#allocation10 + $0x8] sm:$0xff]  ;;  %v761_v24 = vld [vmem:[#allocation10 + $0x40] sm:$0xff]  ;;  %v763_v29 = vld [vmem:[#allocation10 + $0x50] sm:$0xff] }
  0x94   :  { %2470 = vmatpush3.bf16.msra.mxu0 %v2469_v39  ;;  %2502 = vmatpush3.bf16.msra.mxu1 %v2469_v39  ;;  %v338_v39 = vld [vmem:[#allocation13 + $0x58] sm:$0xff]  ;;  %v762_v26 = vld [vmem:[#allocation10 + $0x48] sm:$0xff]  ;;  %v765_v33 = vld [vmem:[#allocation10 + $0x60] sm:$0xff] }
  0x95   :  { %2472 = vmatprep.subr.bf16.mxu0 %v2471_v40  ;;  %2504 = vmatprep.subr.bf16.mxu1 %v2471_v40  ;;  %v3325_v40 = vpack.c.bf16 %v338_v39, %v337_v38  ;;  %v2644_v27 = vpack.c.bf16 %v762_v26, %v761_v24  ;;  %v764_v30 = vld [vmem:[#allocation10 + $0x58] sm:$0xff]  ;;  %v766_v35 = vld [vmem:[#allocation10 + $0x68] sm:$0xff]  ;;  %v767_v38 = vld [vmem:[#allocation10 + $0x70] sm:$0xff] }
  0x96   :  { %v2647_v32 = vpack.c.bf16 %v764_v30, %v763_v29  ;;  %v2650_v36 = vpack.c.bf16 %v766_v35, %v765_v33  ;;  %v768_v39 = vld [vmem:[#allocation10 + $0x78] sm:$0xff]  ;;  %v1168_v24 = vld [vmem:[#allocation11 + $0x28] sm:$0xff]  ;;  %v1169_v30 = vld [vmem:[#allocation11 + $0x30] sm:$0xff] }
  0x97   :  { %v2653_v41 = vpack.c.bf16 %v768_v39, %v767_v38  ;;  %v1171_v38 = vld [vmem:[#allocation11 + $0x40] sm:$0xff]  ;;  %v1172_v39 = vld [vmem:[#allocation11 + $0x48] sm:$0xff] }
  0x98   :  { %2474 = vmatpush3.bf16.msra.mxu0 %v2473_v45  ;;  %2506 = vmatpush3.bf16.msra.mxu1 %v2473_v45  ;;  %v342_v45 = vld [vmem:[#allocation13 + $0x78] sm:$0xff] }
  0x99   :  { %2476 = vmatprep.subr.bf16.mxu0 %v2475_v46  ;;  %2508 = vmatprep.subr.bf16.mxu1 %v2475_v46  ;;  %v3337_v46 = vpack.c.bf16 %v342_v45, %v341_v44 }
  0x9c   :  { %2478 = vmatpush3.bf16.msra.mxu0 %v2477_v49  ;;  %2510 = vmatpush3.bf16.msra.mxu1 %v2477_v49 }
  0x9d   :  { %2511 = vmatprep.subr.bf16.mxu0 %v3103_v55  ;;  %2535 = vmatprep.subr.bf16.mxu1 %v3103_v55 }
  0x9f   :  { %238 = vmatmul.mubr.f32.vlgmr.msra.gmra.mrb[0].mxu0 %v130_v52  ;;  %308 = vmatmul.mubr.f32.vlgmr.msra.gmra.mrb[0].mxu1 %v132_v53 }
  0xa0   :  { %2513 = vmatpush3.bf16.msra.mxu0 %v2512_v54  ;;  %2537 = vmatpush3.bf16.msra.mxu1 %v2512_v54 }
  0xa1   :  { %2514 = vmatprep.subr.bf16.mxu0 %v3103_v55  ;;  %2538 = vmatprep.subr.bf16.mxu1 %v3103_v55 }
  0xa2   :  { %1954 = vmatprep.mubr.msk.f32.mxu0 %vm3104_vm0, %v3105_v13  ;;  %1989 = vmatprep.mubr.msk.f32.mxu1 %vm3104_vm0, %v3105_v13 }
  0xa4   :  { %2516 = vmatpush3.bf16.msra.mxu0 %v2515_v58  ;;  %2540 = vmatpush3.bf16.msra.mxu1 %v2515_v58 }
  0xa5   :  { %2517 = vmatprep.subr.bf16.mxu0 %v3103_v55  ;;  %2541 = vmatprep.subr.bf16.mxu1 %v3103_v55 }
  0xa8   :  { %2519 = vmatpush3.bf16.msra.mxu0 %v2518_v61  ;;  %2543 = vmatpush3.bf16.msra.mxu1 %v2518_v61 }
  0xa9   :  { %2520 = vmatprep.subr.bf16.mxu0 %v3103_v55  ;;  %2544 = vmatprep.subr.bf16.mxu1 %v3103_v55 }
  0xac   :  { %2522 = vmatpush3.bf16.msra.mxu0 %v2521_v0  ;;  %2546 = vmatpush3.bf16.msra.mxu1 %v2521_v0 }
  0xad   :  { %2523 = vmatprep.subr.bf16.mxu0 %v3103_v55  ;;  %2547 = vmatprep.subr.bf16.mxu1 %v3103_v55 }
  0xb0   :  { %2525 = vmatpush3.bf16.msra.mxu0 %v2524_v3  ;;  %2549 = vmatpush3.bf16.msra.mxu1 %v2524_v3 }
  0xb1   :  { %2526 = vmatprep.subr.bf16.mxu0 %v3103_v55  ;;  %2550 = vmatprep.subr.bf16.mxu1 %v3103_v55 }
  0xb4   :  { %2528 = vmatpush3.bf16.msra.mxu0 %v2527_v6  ;;  %2552 = vmatpush3.bf16.msra.mxu1 %v2527_v6  ;;  %v753_v6 = vld [vmem:[#allocation10] sm:$0xff] }
  0xb5   :  { %2529 = vmatprep.subr.bf16.mxu0 %v3103_v55  ;;  %2553 = vmatprep.subr.bf16.mxu1 %v3103_v55  ;;  %v3348_v11 = vpack.c.bf16 %v754_v7, %v753_v6 }
  0xb8   :  { %2531 = vmatpush3.bf16.msra.mxu0 %v2530_v9  ;;  %2555 = vmatpush3.bf16.msra.mxu1 %v2530_v9 }
  0xb9   :  { %2532 = vmatprep.subr.bf16.mxu0 %v3103_v55  ;;  %2556 = vmatprep.subr.bf16.mxu1 %v3103_v55 }
  0xbc   :  { %2534 = vmatpush3.bf16.msra.mxu0 %v2533_v12  ;;  %2558 = vmatpush3.bf16.msra.mxu1 %v2533_v12 }
  0xbd   :  { %2559 = vmatprep.subr.bf16.mxu0 %v3103_v55  ;;  %2583 = vmatprep.subr.bf16.mxu1 %v3103_v55 }
 0x172   :  { %v1629_v14 = vpop.f32.mrb[0].mxu0  ;;  %v1664_v15 = vpop.f32.mrb[0].mxu1 }
 0x173   :  { %v1630_v17 = vpop.f32.mrb[1].mxu0  ;;  %v1665_v18 = vpop.f32.mrb[1].mxu1 }
 0x174   :  { %v1631_v19 = vadd.f32 %v1630_v17, %v1629_v14  ;;  %v1666_v20 = vadd.f32 %v1665_v18, %v1664_v15  ;;  %v755_v14 = vld [vmem:[#allocation10 + $0x10] sm:$0xff]  ;;  %v756_v15 = vld [vmem:[#allocation10 + $0x18] sm:$0xff]  ;;  %v757_v18 = vld [vmem:[#allocation10 + $0x20] sm:$0xff] }
 0x175   :  { %v2635_v17 = vpack.c.bf16 %v756_v15, %v755_v14 }
 0x176   :  { %v240_v21 = vadd.f32 %v1631_v19, %v1592_v16  ;;  %v310_v22 = vadd.f32 %v1666_v20, %v1592_v16  ;;  %v758_v19 = vld [vmem:[#allocation10 + $0x28] sm:$0xff] }
 0x177   :  { %v2638_v20 = vpack.c.bf16 %v758_v19, %v757_v18  ;;  %v1166_v18 = vld [vmem:[#allocation11 + $0x18] sm:$0xff] }
 0x178   :  { %1955 = vmatmul.mubr.f32.vlgmr.msra.gmra.mrb[2].mxu0 %v240_v21  ;;  %1990 = vmatmul.mubr.f32.vlgmr.msra.gmra.mrb[2].mxu1 %v310_v22  ;;  %v759_v21 = vld [vmem:[#allocation10 + $0x30] sm:$0xff]  ;;  %v760_v22 = vld [vmem:[#allocation10 + $0x38] sm:$0xff] }
 0x179   :  { %2024 = vmatprep.mubr.msk.f32.mxu0 %vm3104_vm0, %v3105_v13  ;;  %2059 = vmatprep.mubr.msk.f32.mxu1 %vm3104_vm0, %v3105_v13  ;;  %v2641_v23 = vpack.c.bf16 %v760_v22, %v759_v21 }
 0x17a   :  { %2561 = vmatpush3.bf16.msra.mxu0 %v3295_v25  ;;  %2585 = vmatpush3.bf16.msra.mxu1 %v3295_v25 }
 0x17b   :  { %2562 = vmatprep.subr.bf16.mxu0 %v3103_v55  ;;  %2586 = vmatprep.subr.bf16.mxu1 %v3103_v55 }
 0x17e   :  { %2564 = vmatpush3.bf16.msra.mxu0 %v3301_v28  ;;  %2588 = vmatpush3.bf16.msra.mxu1 %v3301_v28 }
 0x17f   :  { %2565 = vmatprep.subr.bf16.mxu0 %v3103_v55  ;;  %2589 = vmatprep.subr.bf16.mxu1 %v3103_v55 }
 0x182   :  { %2567 = vmatpush3.bf16.msra.mxu0 %v3307_v31  ;;  %2591 = vmatpush3.bf16.msra.mxu1 %v3307_v31 }
 0x183   :  { %2568 = vmatprep.subr.bf16.mxu0 %v3103_v55  ;;  %2592 = vmatprep.subr.bf16.mxu1 %v3103_v55 }
 0x186   :  { %2570 = vmatpush3.bf16.msra.mxu0 %v3313_v34  ;;  %2594 = vmatpush3.bf16.msra.mxu1 %v3313_v34 }
 0x187   :  { %2571 = vmatprep.subr.bf16.mxu0 %v3103_v55  ;;  %2595 = vmatprep.subr.bf16.mxu1 %v3103_v55 }
 0x18a   :  { %2573 = vmatpush3.bf16.msra.mxu0 %v3319_v37  ;;  %2597 = vmatpush3.bf16.msra.mxu1 %v3319_v37 }
 0x18b   :  { %2574 = vmatprep.subr.bf16.mxu0 %v3103_v55  ;;  %2598 = vmatprep.subr.bf16.mxu1 %v3103_v55 }
 0x18e   :  { %2576 = vmatpush3.bf16.msra.mxu0 %v3325_v40  ;;  %2600 = vmatpush3.bf16.msra.mxu1 %v3325_v40 }
 0x18f   :  { %2577 = vmatprep.subr.bf16.mxu0 %v3103_v55  ;;  %2601 = vmatprep.subr.bf16.mxu1 %v3103_v55 }
 0x192   :  { %2579 = vmatpush3.bf16.msra.mxu0 %v3331_v43  ;;  %2603 = vmatpush3.bf16.msra.mxu1 %v3331_v43 }
 0x193   :  { %2580 = vmatprep.subr.bf16.mxu0 %v3103_v55  ;;  %2604 = vmatprep.subr.bf16.mxu1 %v3103_v55 }
 0x196   :  { %2582 = vmatpush3.bf16.msra.mxu0 %v3337_v46  ;;  %2606 = vmatpush3.bf16.msra.mxu1 %v3337_v46 }
 0x197   :  { %2607 = vmatprep.subr.bf16.mxu0 %v3103_v55  ;;  %2631 = vmatprep.subr.bf16.mxu1 %v3103_v55 }
 0x24b   :  { %v432_v48 = vpop.f32.mrb[2].mxu0  ;;  %v511_v49 = vpop.f32.mrb[2].mxu1 }
 0x24c   :  { %v433_v50 = vadd.f32 %v1594_v47, %v432_v48  ;;  %v512_v51 = vadd.f32 %v1594_v47, %v511_v49  ;;  %v1956_v52 = vpop.f32.mrb[3].mxu0  ;;  %v1991_v53 = vpop.f32.mrb[3].mxu1  ;;  %v314_v49 = vlaneseq }
 0x24e   :  { %v436_v54 = vmul.f32 %v433_v50, %v433_v50  ;;  %v515_v56 = vmul.f32 %v512_v51, %v512_v51 }
 0x250   :  { %v437_v57 = vmul.f32 %v436_v54, %v433_v50  ;;  %v516_v58 = vmul.f32 %v515_v56, %v512_v51 }
 0x252   :  { %v438_v59 = vmul.f32 0.044715, %v437_v57  ;;  %v517_v60 = vmul.f32 0.044715, %v516_v58 }
 0x254   :  { %v439_v61 = vadd.f32 %v438_v59, %v433_v50  ;;  %v518_v62 = vadd.f32 %v517_v60, %v512_v51  ;;  %v317_v59 = vand.u32 127, %v314_v49 }
 0x256   :  { %v440_v63 = vmul.f32 0.7978846, %v439_v61  ;;  %v519_v0 = vmul.f32 0.7978846, %v518_v62  ;;  %vm323_vm2 = vcmp.lt.s32.totalorder %v317_v59, 4 }
 0x258   :  { %2890 = vtanh.f32 %v440_v63 }
 0x259   :  { %2892 = vtanh.f32 %v519_v0 }
 0x262   :  { %v2891_v1 = vpop.eup %2890 }
 0x263   :  { %v2893_v2 = vpop.eup %2892  ;;  %v442_v3 = vadd.f32 1.0, %v2891_v1 }
 0x264   :  { %v521_v4 = vadd.f32 1.0, %v2893_v2 }
 0x265   :  { %v443_v5 = vmul.f32 0.5, %v442_v3 }
 0x266   :  { %v522_v8 = vmul.f32 0.5, %v521_v4 }
 0x267   :  { %v444_v9 = vmul.f32 %v443_v5, %v433_v50  ;;  %v1595_v50 = vld [vmem:[%s3579_s7] ss:$0 sm:$0xff] }
 0x268   :  { %v3346_v10 = vmul.f32 %v522_v8, %v512_v51  ;;  %v315_v51 = vshrl.u32 %v314_v49, 7  ;;  %v1176_v49 = vld [vmem:[#allocation11 + $0x68] sm:$0xff] }
 0x269   :  { %v595_v12 = vmul.f32 %v444_v9, %v444_v9 }
 0x26a   :  { %v524_v16 = vmul.f32 %v3346_v10, %v444_v9  ;;  %v666_v42 = vmul.f32 %v3346_v10, %v3346_v10  ;;  %v320_v60 = vmul.u32 4, %v315_v51  ;;  %v1177_v51 = vld [vmem:[#allocation11 + $0x70] sm:$0xff] }
 0x26b   :  { %2060 = vmatmul.mubr.f32.vlgmr.msra.gmra.mrb[4].mxu1 %v595_v12  ;;  %v1164_v12 = vld [vmem:[#allocation11 + $0x8] sm:$0xff] }
 0x26c   :  { %2025 = vmatmul.mubr.f32.vlgmr.msra.gmra.mrb[4].mxu0 %v524_v16  ;;  %2633 = vmatpush3.bf16.msra.mxu1 %v3348_v11  ;;  %v321_v0 = vadd.s32 %v320_v60, %v317_v59 }
 0x26d   :  { %2609 = vmatpush3.bf16.msra.mxu0 %v3295_v25  ;;  %2634 = vmatprep.subr.bf16.mxu1 %v3103_v55 }
 0x26e   :  { %2610 = vmatprep.subr.bf16.mxu0 %v3103_v55  ;;  %2094 = vmatprep.mubr.msk.f32.mxu0 %vm3104_vm0, %v3105_v13  ;;  %vm322_vm1 = vcmp.lt.s32.totalorder %v321_v0, 32 }
 0x26f   :  { %2129 = vmatprep.mubr.msk.f32.mxu1 %vm3104_vm0, %v3105_v13  ;;  %vm324_vm3 = vmand %vm322_vm1, %vm323_vm2 }
 0x270   :  { %2636 = vmatpush3.bf16.msra.mxu1 %v2635_v17  ;;  %v3434_v5 = vsel %vm324_vm3, 1.0, %v3105_v13 }
 0x271   :  { %2612 = vmatpush3.bf16.msra.mxu0 %v3301_v28  ;;  %2637 = vmatprep.subr.bf16.mxu1 %v3103_v55 }
 0x272   :  { %2613 = vmatprep.subr.bf16.mxu0 %v3103_v55 }
 0x274   :  { %2639 = vmatpush3.bf16.msra.mxu1 %v2638_v20 }
 0x275   :  { %2615 = vmatpush3.bf16.msra.mxu0 %v3307_v31  ;;  %2640 = vmatprep.subr.bf16.mxu1 %v3103_v55 }
 0x276   :  { %2616 = vmatprep.subr.bf16.mxu0 %v3103_v55 }
 0x278   :  { %2642 = vmatpush3.bf16.msra.mxu1 %v2641_v23 }
 0x279   :  { %2618 = vmatpush3.bf16.msra.mxu0 %v3313_v34  ;;  %2643 = vmatprep.subr.bf16.mxu1 %v3103_v55 }
 0x27a   :  { %2619 = vmatprep.subr.bf16.mxu0 %v3103_v55 }
 0x27c   :  { %2645 = vmatpush3.bf16.msra.mxu1 %v2644_v27 }
 0x27d   :  { %2621 = vmatpush3.bf16.msra.mxu0 %v3319_v37  ;;  %2646 = vmatprep.subr.bf16.mxu1 %v3103_v55 }
 0x27e   :  { %2622 = vmatprep.subr.bf16.mxu0 %v3103_v55 }
 0x280   :  { %2648 = vmatpush3.bf16.msra.mxu1 %v2647_v32 }
 0x281   :  { %2624 = vmatpush3.bf16.msra.mxu0 %v3325_v40  ;;  %2649 = vmatprep.subr.bf16.mxu1 %v3103_v55 }
 0x282   :  { %2625 = vmatprep.subr.bf16.mxu0 %v3103_v55 }
 0x284   :  { %2651 = vmatpush3.bf16.msra.mxu1 %v2650_v36 }
 0x285   :  { %2627 = vmatpush3.bf16.msra.mxu0 %v3331_v43  ;;  %2652 = vmatprep.subr.bf16.mxu1 %v3103_v55 }
 0x286   :  { %2628 = vmatprep.subr.bf16.mxu0 %v3103_v55 }
 0x288   :  { %2654 = vmatpush3.bf16.msra.mxu1 %v2653_v41 }
 0x289   :  { %2630 = vmatpush3.bf16.msra.mxu0 %v3337_v46  ;;  %2679 = vmatprep.subr.bf16.mxu1 %v3103_v55 }
 0x28a   :  { %2655 = vmatprep.subr.bf16.mxu0 %v3103_v55 }
 0x28b   :  { %2130 = vmatmul.mubr.f32.vlgmr.msra.gmra.mrb[6].mxu1 %v444_v9 }
 0x28c   :  { %2095 = vmatmul.mubr.f32.vlgmr.msra.gmra.mrb[6].mxu0 %v666_v42  ;;  %2681 = vmatpush3.bf16.msra.mxu1 %v3295_v25  ;;  %v3454_v42 = vpack.c.bf16 %v1172_v39, %v1171_v38 }
 0x28d   :  { %2657 = vmatpush3.bf16.msra.mxu0 %v3348_v11  ;;  %2164 = vmatprep.mubr.msk.f32.mxu0 %vm3104_vm0, %v3105_v13  ;;  %v1163_v11 = vld [vmem:[#allocation11] sm:$0xff] }
 0x28e   :  { %2658 = vmatprep.subr.bf16.mxu0 %v3103_v55  ;;  %2682 = vmatprep.subr.bf16.mxu1 %v3103_v55  ;;  %v3437_v15 = vpack.c.bf16 %v1164_v12, %v1163_v11 }
 0x28f   :  { %2199 = vmatprep.mubr.msk.f32.mxu1 %vm3104_vm0, %v3105_v13 }
 0x290   :  { %2684 = vmatpush3.bf16.msra.mxu1 %v3301_v28 }
 0x291   :  { %2660 = vmatpush3.bf16.msra.mxu0 %v2635_v17  ;;  %2685 = vmatprep.subr.bf16.mxu1 %v3103_v55  ;;  %v1165_v17 = vld [vmem:[#allocation11 + $0x10] sm:$0xff] }
 0x292   :  { %2661 = vmatprep.subr.bf16.mxu0 %v3103_v55 }
 0x294   :  { %2687 = vmatpush3.bf16.msra.mxu1 %v3307_v31 }
 0x295   :  { %2663 = vmatpush3.bf16.msra.mxu0 %v2638_v20  ;;  %2688 = vmatprep.subr.bf16.mxu1 %v3103_v55  ;;  %v3440_v20 = vpack.c.bf16 %v1166_v18, %v1165_v17 }
 0x296   :  { %2664 = vmatprep.subr.bf16.mxu0 %v3103_v55 }
 0x298   :  { %2690 = vmatpush3.bf16.msra.mxu1 %v3313_v34 }
 0x299   :  { %2666 = vmatpush3.bf16.msra.mxu0 %v2641_v23  ;;  %2691 = vmatprep.subr.bf16.mxu1 %v3103_v55  ;;  %v1167_v23 = vld [vmem:[#allocation11 + $0x20] sm:$0xff] }
 0x29a   :  { %2667 = vmatprep.subr.bf16.mxu0 %v3103_v55 }
 0x29c   :  { %2693 = vmatpush3.bf16.msra.mxu1 %v3319_v37 }
 0x29d   :  { %2669 = vmatpush3.bf16.msra.mxu0 %v2644_v27  ;;  %2694 = vmatprep.subr.bf16.mxu1 %v3103_v55  ;;  %v3446_v27 = vpack.c.bf16 %v1168_v24, %v1167_v23 }
 0x29e   :  { %2670 = vmatprep.subr.bf16.mxu0 %v3103_v55 }
 0x2a0   :  { %2696 = vmatpush3.bf16.msra.mxu1 %v3325_v40 }
 0x2a1   :  { %2672 = vmatpush3.bf16.msra.mxu0 %v2647_v32  ;;  %2697 = vmatprep.subr.bf16.mxu1 %v3103_v55  ;;  %v1170_v32 = vld [vmem:[#allocation11 + $0x38] sm:$0xff] }
 0x2a2   :  { %2673 = vmatprep.subr.bf16.mxu0 %v3103_v55  ;;  %v3450_v35 = vpack.c.bf16 %v1170_v32, %v1169_v30 }
 0x2a4   :  { %2699 = vmatpush3.bf16.msra.mxu1 %v3331_v43 }
 0x2a5   :  { %2675 = vmatpush3.bf16.msra.mxu0 %v2650_v36  ;;  %2700 = vmatprep.subr.bf16.mxu1 %v3103_v55 }
 0x2a6   :  { %2676 = vmatprep.subr.bf16.mxu0 %v3103_v55 }
 0x2a8   :  { %2702 = vmatpush3.bf16.msra.mxu1 %v3337_v46 }
 0x2a9   :  { %2678 = vmatpush3.bf16.msra.mxu0 %v2653_v41  ;;  %2727 = vmatprep.subr.bf16.mxu1 %v3103_v55 }
 0x2aa   :  { %2703 = vmatprep.subr.bf16.mxu0 %v3103_v55 }
 0x2ac   :  { %2165 = vmatmul.mubr.f32.vlgmr.msra.gmra.mrb[8].mxu0 %v3346_v10 }
 0x2ad   :  { %2705 = vmatpush3.bf16.msra.mxu0 %v3295_v25  ;;  %2234 = vmatprep.mubr.msk.f32.mxu0 %vm3104_vm0, %v3105_v13 }
 0x2ae   :  { %2706 = vmatprep.subr.bf16.mxu0 %v3103_v55 }
 0x2b1   :  { %2708 = vmatpush3.bf16.msra.mxu0 %v3301_v28 }
 0x2b2   :  { %2709 = vmatprep.subr.bf16.mxu0 %v3103_v55 }
 0x2b5   :  { %2711 = vmatpush3.bf16.msra.mxu0 %v3307_v31 }
 0x2b6   :  { %2712 = vmatprep.subr.bf16.mxu0 %v3103_v55 }
 0x2b9   :  { %2714 = vmatpush3.bf16.msra.mxu0 %v3313_v34 }
 0x2ba   :  { %2715 = vmatprep.subr.bf16.mxu0 %v3103_v55 }
 0x2bd   :  { %2717 = vmatpush3.bf16.msra.mxu0 %v3319_v37 }
 0x2be   :  { %2718 = vmatprep.subr.bf16.mxu0 %v3103_v55 }
 0x2c1   :  { %2720 = vmatpush3.bf16.msra.mxu0 %v3325_v40 }
 0x2c2   :  { %2721 = vmatprep.subr.bf16.mxu0 %v3103_v55 }
 0x2c5   :  { %2723 = vmatpush3.bf16.msra.mxu0 %v3331_v43 }
 0x2c6   :  { %2724 = vmatprep.subr.bf16.mxu0 %v3103_v55 }
 0x2c9   :  { %2726 = vmatpush3.bf16.msra.mxu0 %v3337_v46 }
 0x2ca   :  { %2751 = vmatprep.subr.bf16.mxu0 %v3103_v55 }
 0x33e   :  { %v662_v44 = vpop.f32.mrb[4].mxu1 }
 0x33f   :  { %v591_v45 = vpop.f32.mrb[4].mxu0  ;;  %v2061_v47 = vpop.f32.mrb[5].mxu1 }
 0x340   :  { %v2026_v48 = vpop.f32.mrb[5].mxu0 }
 0x341   :  { %v1175_v48 = vld [vmem:[#allocation11 + $0x60] sm:$0xff] }
 0x35e   :  { %v842_v52 = vpop.f32.mrb[6].mxu1 }
 0x35f   :  { %v733_v53 = vpop.f32.mrb[6].mxu0  ;;  %v843_v54 = vadd.f32 %v1595_v50, %v842_v52  ;;  %v2131_v56 = vpop.f32.mrb[7].mxu1  ;;  %v1178_v52 = vld [vmem:[#allocation11 + $0x78] sm:$0xff] }
 0x360   :  { %v737_v57 = vmul.f32 %v733_v53, %v662_v44  ;;  %v2096_v58 = vpop.f32.mrb[7].mxu0  ;;  %v1173_v44 = vld [vmem:[#allocation11 + $0x50] sm:$0xff]  ;;  %v2773_v56 = vpack.c.bf16 %v1178_v52, %v1177_v51 }
 0x361   :  { %v846_v61 = vmul.f32 %v843_v54, %v843_v54 }
 0x362   :  { %v738_v62 = vmax.f32 %v737_v57, 1e-16 }
 0x363   :  { %v847_v63 = vmul.f32 %v846_v61, %v843_v54 }
 0x364   :  { %2894 = vrsqrt.f32 %v738_v62 }
 0x365   :  { %v848_v1 = vmul.f32 0.044715, %v847_v63 }
 0x367   :  { %v849_v2 = vadd.f32 %v848_v1, %v843_v54 }
 0x369   :  { %v850_v3 = vmul.f32 0.7978846, %v849_v2 }
 0x36b   :  { %2896 = vtanh.f32 %v850_v3 }
 0x36e   :  { %v2895_v4 = vpop.eup %2894 }
 0x36f   :  { %v740_v6 = vmul.f32 %v2895_v4, %v591_v45  ;;  %v1174_v45 = vld [vmem:[#allocation11 + $0x58] sm:$0xff] }
 0x370   :  { %v3458_v47 = vpack.c.bf16 %v1174_v45, %v1173_v44 }
 0x371   :  { %v741_v7 = vmul.f32 %v3434_v5, %v740_v6 }
 0x373   :  { %742 = vadd.xlane.f32.xlu0 %v741_v7  ;;  %v1596_v7 = vld [vmem:[%s3581_s9] ss:$0 sm:$0xff] }
 0x375   :  { %v2897_v8 = vpop.eup %2896 }
 0x376   :  { %v852_v9 = vadd.f32 1.0, %v2897_v8 }
 0x378   :  { %v853_v10 = vmul.f32 0.5, %v852_v9 }
 0x37a   :  { %v854_v14 = vmul.f32 %v853_v10, %v843_v54 }
 0x37c   :  { %v1005_v16 = vmul.f32 %v854_v14, %v854_v14 }
 0x37e   :  { %2235 = vmatmul.mubr.f32.vlgmr.msra.gmra.mrb[10].mxu0 %v1005_v16 }
 0x37f   :  { %v921_v19 = vpop.f32.mrb[8].mxu0  ;;  %2753 = vmatpush3.bf16.msra.mxu0 %v3437_v15  ;;  %2304 = vmatprep.mubr.msk.f32.mxu0 %vm3104_vm0, %v3105_v13 }
 0x380   :  { %v922_v21 = vadd.f32 %v1595_v50, %v921_v19  ;;  %v2166_v22 = vpop.f32.mrb[9].mxu0  ;;  %2754 = vmatprep.subr.bf16.mxu0 %v3103_v55  ;;  %v3462_v50 = vpack.c.bf16 %v1176_v49, %v1175_v48 }
 0x382   :  { %v925_v26 = vmul.f32 %v922_v21, %v922_v21 }
 0x383   :  { %2756 = vmatpush3.bf16.msra.mxu0 %v3440_v20 }
 0x384   :  { %v926_v29 = vmul.f32 %v925_v26, %v922_v21  ;;  %2757 = vmatprep.subr.bf16.mxu0 %v3103_v55 }
 0x386   :  { %v927_v33 = vmul.f32 0.044715, %v926_v29 }
 0x387   :  { %2759 = vmatpush3.bf16.msra.mxu0 %v3446_v27 }
 0x388   :  { %v928_v36 = vadd.f32 %v927_v33, %v922_v21  ;;  %2760 = vmatprep.subr.bf16.mxu0 %v3103_v55 }
 0x38a   :  { %v929_v41 = vmul.f32 0.7978846, %v928_v36 }
 0x38b   :  { %2762 = vmatpush3.bf16.msra.mxu0 %v3450_v35 }
 0x38c   :  { %2898 = vtanh.f32 %v929_v41  ;;  %2763 = vmatprep.subr.bf16.mxu0 %v3103_v55 }
 0x38f   :  { %2765 = vmatpush3.bf16.msra.mxu0 %v3454_v42 }
 0x390   :  { %2766 = vmatprep.subr.bf16.mxu0 %v3103_v55 }
 0x393   :  { %2768 = vmatpush3.bf16.msra.mxu0 %v3458_v47 }
 0x394   :  { %2769 = vmatprep.subr.bf16.mxu0 %v3103_v55 }
 0x396   :  { %v2899_v53 = vpop.eup %2898 }
 0x397   :  { %v931_v54 = vadd.f32 1.0, %v2899_v53  ;;  %2771 = vmatpush3.bf16.msra.mxu0 %v3462_v50 }
 0x398   :  { %2772 = vmatprep.subr.bf16.mxu0 %v3103_v55 }
 0x399   :  { %v932_v57 = vmul.f32 0.5, %v931_v54 }
 0x39b   :  { %v933_v58 = vmul.f32 %v932_v57, %v922_v21  ;;  %2774 = vmatpush3.bf16.msra.mxu0 %v2773_v56 }
 0x39c   :  { %2799 = vmatprep.subr.bf16.mxu0 %v3103_v55 }
 0x39d   :  { %v934_v59 = vmul.f32 %v933_v58, %v854_v14  ;;  %v1076_v60 = vmul.f32 %v933_v58, %v933_v58 }
 0x39e   :  { %2305 = vmatmul.mubr.f32.vlgmr.msra.gmra.mrb[12].mxu0 %v854_v14 }
 0x39f   :  { %2200 = vmatmul.mubr.f32.vlgmr.msra.gmra.mrb[8].mxu1 %v934_v59  ;;  %2801 = vmatpush3.bf16.msra.mxu0 %v3295_v25 }
 0x3a0   :  { %2729 = vmatpush3.bf16.msra.mxu1 %v3295_v25  ;;  %2269 = vmatprep.mubr.msk.f32.mxu1 %vm3104_vm0, %v3105_v13 }
 0x3a1   :  { %2730 = vmatprep.subr.bf16.mxu1 %v3103_v55  ;;  %2802 = vmatprep.subr.bf16.mxu0 %v3103_v55 }
 0x3a2   :  { %2374 = vmatprep.mubr.msk.f32.mxu0 %vm3104_vm0, %v3105_v13 }
 0x3a3   :  { %2804 = vmatpush3.bf16.msra.mxu0 %v3301_v28 }
 0x3a4   :  { %2732 = vmatpush3.bf16.msra.mxu1 %v3301_v28  ;;  %2805 = vmatprep.subr.bf16.mxu0 %v3103_v55 }
 0x3a5   :  { %2733 = vmatprep.subr.bf16.mxu1 %v3103_v55 }
 0x3a7   :  { %2807 = vmatpush3.bf16.msra.mxu0 %v3307_v31 }
 0x3a8   :  { %2735 = vmatpush3.bf16.msra.mxu1 %v3307_v31  ;;  %2808 = vmatprep.subr.bf16.mxu0 %v3103_v55 }
 0x3a9   :  { %2736 = vmatprep.subr.bf16.mxu1 %v3103_v55 }
 0x3ab   :  { %2810 = vmatpush3.bf16.msra.mxu0 %v3313_v34 }
 0x3ac   :  { %2738 = vmatpush3.bf16.msra.mxu1 %v3313_v34  ;;  %2811 = vmatprep.subr.bf16.mxu0 %v3103_v55 }
 0x3ad   :  { %2739 = vmatprep.subr.bf16.mxu1 %v3103_v55 }
 0x3af   :  { %2813 = vmatpush3.bf16.msra.mxu0 %v3319_v37 }
 0x3b0   :  { %2741 = vmatpush3.bf16.msra.mxu1 %v3319_v37  ;;  %2814 = vmatprep.subr.bf16.mxu0 %v3103_v55 }
 0x3b1   :  { %2742 = vmatprep.subr.bf16.mxu1 %v3103_v55 }
 0x3b3   :  { %2816 = vmatpush3.bf16.msra.mxu0 %v3325_v40 }
 0x3b4   :  { %2744 = vmatpush3.bf16.msra.mxu1 %v3325_v40  ;;  %2817 = vmatprep.subr.bf16.mxu0 %v3103_v55 }
 0x3b5   :  { %2745 = vmatprep.subr.bf16.mxu1 %v3103_v55 }
 0x3b7   :  { %2819 = vmatpush3.bf16.msra.mxu0 %v3331_v43 }
 0x3b8   :  { %2747 = vmatpush3.bf16.msra.mxu1 %v3331_v43  ;;  %2820 = vmatprep.subr.bf16.mxu0 %v3103_v55 }
 0x3b9   :  { %2748 = vmatprep.subr.bf16.mxu1 %v3103_v55 }
 0x3bb   :  { %2822 = vmatpush3.bf16.msra.mxu0 %v3337_v46 }
 0x3bc   :  { %2750 = vmatpush3.bf16.msra.mxu1 %v3337_v46  ;;  %2847 = vmatprep.subr.bf16.mxu0 %v3103_v55 }
 0x3bd   :  { %2775 = vmatprep.subr.bf16.mxu1 %v3103_v55 }
 0x3bf   :  { %2270 = vmatmul.mubr.f32.vlgmr.msra.gmra.mrb[10].mxu1 %v1076_v60 }
 0x3c0   :  { %2777 = vmatpush3.bf16.msra.mxu1 %v3437_v15  ;;  %2339 = vmatprep.mubr.msk.f32.mxu1 %vm3104_vm0, %v3105_v13 }
 0x3c1   :  { %2778 = vmatprep.subr.bf16.mxu1 %v3103_v55 }
 0x3c4   :  { %2780 = vmatpush3.bf16.msra.mxu1 %v3440_v20 }
 0x3c5   :  { %2781 = vmatprep.subr.bf16.mxu1 %v3103_v55 }
 0x3c8   :  { %2783 = vmatpush3.bf16.msra.mxu1 %v3446_v27 }
 0x3c9   :  { %2784 = vmatprep.subr.bf16.mxu1 %v3103_v55 }
 0x3cc   :  { %2786 = vmatpush3.bf16.msra.mxu1 %v3450_v35 }
 0x3cd   :  { %2787 = vmatprep.subr.bf16.mxu1 %v3103_v55 }
 0x3d0   :  { %2789 = vmatpush3.bf16.msra.mxu1 %v3454_v42 }
 0x3d1   :  { %2790 = vmatprep.subr.bf16.mxu1 %v3103_v55 }
 0x3d4   :  { %2792 = vmatpush3.bf16.msra.mxu1 %v3458_v47 }
 0x3d5   :  { %2793 = vmatprep.subr.bf16.mxu1 %v3103_v55 }
 0x3d8   :  { %2795 = vmatpush3.bf16.msra.mxu1 %v3462_v50 }
 0x3d9   :  { %2796 = vmatprep.subr.bf16.mxu1 %v3103_v55 }
 0x3dc   :  { %2798 = vmatpush3.bf16.msra.mxu1 %v2773_v56 }
 0x3dd   :  { %2823 = vmatprep.subr.bf16.mxu1 %v3103_v55 }
 0x3df   :  { %2340 = vmatmul.mubr.f32.vlgmr.msra.gmra.mrb[12].mxu1 %v933_v58 }
 0x3e0   :  { %2825 = vmatpush3.bf16.msra.mxu1 %v3295_v25  ;;  %2409 = vmatprep.mubr.msk.f32.mxu1 %vm3104_vm0, %v3105_v13 }
 0x3e1   :  { %2826 = vmatprep.subr.bf16.mxu1 %v3103_v55 }
 0x3e4   :  { %2828 = vmatpush3.bf16.msra.mxu1 %v3301_v28 }
 0x3e5   :  { %2829 = vmatprep.subr.bf16.mxu1 %v3103_v55 }
 0x3e8   :  { %2831 = vmatpush3.bf16.msra.mxu1 %v3307_v31 }
 0x3e9   :  { %2832 = vmatprep.subr.bf16.mxu1 %v3103_v55 }
 0x3ec   :  { %2834 = vmatpush3.bf16.msra.mxu1 %v3313_v34 }
 0x3ed   :  { %2835 = vmatprep.subr.bf16.mxu1 %v3103_v55 }
 0x3f0   :  { %2837 = vmatpush3.bf16.msra.mxu1 %v3319_v37 }
 0x3f1   :  { %2838 = vmatprep.subr.bf16.mxu1 %v3103_v55 }
 0x3f4   :  { %2840 = vmatpush3.bf16.msra.mxu1 %v3325_v40 }
 0x3f5   :  { %2841 = vmatprep.subr.bf16.mxu1 %v3103_v55 }
 0x3f8   :  { %2843 = vmatpush3.bf16.msra.mxu1 %v3331_v43 }
 0x3f9   :  { %2844 = vmatprep.subr.bf16.mxu1 %v3103_v55 }
 0x3fc   :  { %2846 = vmatpush3.bf16.msra.mxu1 %v3337_v46 }
 0x400   :  { %v743_v61 = vpop.xlane.xlu0 %742 }
 0x401   :  { %v744_v62 = vrot.slane %v743_v61, 4 }
 0x403   :  { %v745_v63 = vadd.f32 %v744_v62, %v743_v61 }
 0x405   :  { %v746_v0 = vrot.slane %v745_v63, 2 }
 0x407   :  { %v747_v1 = vadd.f32 %v746_v0, %v745_v63 }
 0x409   :  { %v748_v2 = vrot.slane %v747_v1, 1 }
 0x40b   :  { %v749_v3 = vadd.f32 %v748_v2, %v747_v1 }
 0x40d   :  { %2871 = vpush %v749_v3 }
 0x43e   :  { %s2872_s9 = spop %2871 }
 0x451   :  { %v1072_v4 = vpop.f32.mrb[10].mxu0 }
 0x452   :  { %v2236_v6 = vpop.f32.mrb[11].mxu0 }
 0x471   :  { %v1252_v8 = vpop.f32.mrb[12].mxu0 }
 0x472   :  { %v1253_v9 = vadd.f32 %v1596_v7, %v1252_v8  ;;  %v1001_v10 = vpop.f32.mrb[8].mxu1  ;;  %v2306_v11 = vpop.f32.mrb[13].mxu0 }
 0x473   :  { %v2201_v12 = vpop.f32.mrb[9].mxu1 }
 0x474   :  { %v1256_v14 = vmul.f32 %v1253_v9, %v1253_v9 }
 0x476   :  { %v1257_v15 = vmul.f32 %v1256_v14, %v1253_v9 }
 0x478   :  { %v1258_v16 = vmul.f32 0.044715, %v1257_v15 }
 0x47a   :  { %v1259_v17 = vadd.f32 %v1258_v16, %v1253_v9 }
 0x47c   :  { %v1260_v18 = vmul.f32 0.7978846, %v1259_v17 }
 0x47e   :  { %2900 = vtanh.f32 %v1260_v18 }
 0x488   :  { %v2901_v19 = vpop.eup %2900 }
 0x489   :  { %v1262_v20 = vadd.f32 1.0, %v2901_v19 }
 0x48b   :  { %v1263_v21 = vmul.f32 0.5, %v1262_v20 }
 0x48d   :  { %v1264_v22 = vmul.f32 %v1263_v21, %v1253_v9 }
 0x48f   :  { %v1415_v23 = vmul.f32 %v1264_v22, %v1264_v22 }
 0x491   :  { %2410 = vmatmul.mubr.f32.vlgmr.msra.gmra.mrb[14].mxu1 %v1415_v23 }
 0x492   :  { %v1143_v24 = vpop.f32.mrb[10].mxu1 }
 0x493   :  { %v1147_v26 = vmul.f32 %v1143_v24, %v1072_v4  ;;  %v2271_v27 = vpop.f32.mrb[11].mxu1 }
 0x495   :  { %v1148_v29 = vmax.f32 %v1147_v26, 1e-16 }
 0x497   :  { %2902 = vrsqrt.f32 %v1148_v29 }
 0x4a1   :  { %v2903_v30 = vpop.eup %2902 }
 0x4a2   :  { %v1150_v32 = vmul.f32 %v2903_v30, %v1001_v10 }
 0x4a4   :  { %v1151_v33 = vmul.f32 %v3434_v5, %v1150_v32 }
 0x4a6   :  { %1152 = vadd.xlane.f32.xlu0 %v1151_v33 }
 0x4b2   :  { %v1331_v35 = vpop.f32.mrb[12].mxu1 }
 0x4b3   :  { %v1332_v36 = vadd.f32 %v1596_v7, %v1331_v35  ;;  %v2341_v38 = vpop.f32.mrb[13].mxu1  ;;  %v751_v7 = vstv %s2872_s9 }
 0x4b5   :  { %v1335_v39 = vmul.f32 %v1332_v36, %v1332_v36 }
 0x4b7   :  { %v1336_v41 = vmul.f32 %v1335_v39, %v1332_v36 }
 0x4b9   :  { %v1337_v42 = vmul.f32 0.044715, %v1336_v41 }
 0x4bb   :  { %v1338_v44 = vadd.f32 %v1337_v42, %v1332_v36 }
 0x4bd   :  { %v1339_v45 = vmul.f32 0.7978846, %v1338_v44 }
 0x4bf   :  { %2904 = vtanh.f32 %v1339_v45 }
 0x4c9   :  { %v2905_v47 = vpop.eup %2904 }
 0x4ca   :  { %v1341_v48 = vadd.f32 1.0, %v2905_v47 }
 0x4cc   :  { %v1342_v49 = vmul.f32 0.5, %v1341_v48 }
 0x4ce   :  { %v1343_v50 = vmul.f32 %v1342_v49, %v1332_v36 }
 0x4d0   :  { %v1344_v51 = vmul.f32 %v1343_v50, %v1264_v22 }
 0x4d2   :  { %2375 = vmatmul.mubr.f32.vlgmr.msra.gmra.mrb[14].mxu0 %v1344_v51 }
 0x4d3   :  { %2849 = vmatpush3.bf16.msra.mxu0 %v3295_v25  ;;  %2444 = vmatprep.mubr.msk.f32.mxu0 %vm3104_vm0, %v3105_v13  ;;  %v1486_v13 = vmul.f32 %v1343_v50, %v1343_v50 }
 0x4d4   :  { %2850 = vmatprep.subr.bf16.mxu0 %v3103_v55 }
 0x4d7   :  { %2852 = vmatpush3.bf16.msra.mxu0 %v3301_v28 }
 0x4d8   :  { %2853 = vmatprep.subr.bf16.mxu0 %v3103_v55 }
 0x4db   :  { %2855 = vmatpush3.bf16.msra.mxu0 %v3307_v31 }
 0x4dc   :  { %2856 = vmatprep.subr.bf16.mxu0 %v3103_v55 }
 0x4df   :  { %2858 = vmatpush3.bf16.msra.mxu0 %v3313_v34 }
 0x4e0   :  { %2859 = vmatprep.subr.bf16.mxu0 %v3103_v55 }
 0x4e3   :  { %2861 = vmatpush3.bf16.msra.mxu0 %v3319_v37 }
 0x4e4   :  { %2862 = vmatprep.subr.bf16.mxu0 %v3103_v55 }
 0x4e7   :  { %2864 = vmatpush3.bf16.msra.mxu0 %v3325_v40 }
 0x4e8   :  { %2865 = vmatprep.subr.bf16.mxu0 %v3103_v55 }
 0x4eb   :  { %2867 = vmatpush3.bf16.msra.mxu0 %v3331_v43 }
 0x4ec   :  { %2868 = vmatprep.subr.bf16.mxu0 %v3103_v55 }
 0x4ef   :  { %2870 = vmatpush3.bf16.msra.mxu0 %v3337_v46 }
 0x4f2   :  { %2445 = vmatmul.mubr.f32.vlgmr.msra.gmra.mrb[16].mxu0 %v1486_v13 }
 0x533   :  { %v1153_v25 = vpop.xlane.xlu0 %1152 }
 0x534   :  { %v1154_v28 = vrot.slane %v1153_v25, 4 }
 0x536   :  { %v1155_v31 = vadd.f32 %v1154_v28, %v1153_v25 }
 0x538   :  { %v1156_v34 = vrot.slane %v1155_v31, 2 }
 0x53a   :  { %v1157_v52 = vadd.f32 %v1156_v34, %v1155_v31 }
 0x53c   :  { %v1158_v37 = vrot.slane %v1157_v52, 1 }
 0x53e   :  { %v1159_v53 = vadd.f32 %v1158_v37, %v1157_v52 }
 0x540   :  { %2873 = vpush %v1159_v53 }
 0x564   :  { %v1482_v54 = vpop.f32.mrb[14].mxu1 }
 0x565   :  { %v2411_v40 = vpop.f32.mrb[15].mxu1 }
 0x571   :  { %s2874_s24 = spop %2873 }
 0x572   :  { %v1161_v6 = vstv %s2874_s24 }
 0x573   :  { %v1162_v8 = vadd.f32 %v1161_v6, %v751_v7 }
 0x5a5   :  { %v1411_v56 = vpop.f32.mrb[14].mxu0 }
 0x5a6   :  { %v2376_v57 = vpop.f32.mrb[15].mxu0 }
 0x5c5   :  { %v1553_v58 = vpop.f32.mrb[16].mxu0 }
 0x5c6   :  { %v1557_v43 = vmul.f32 %v1553_v58, %v1482_v54  ;;  %v2446_v59 = vpop.f32.mrb[17].mxu0 }
 0x5c8   :  { %v1558_v55 = vmax.f32 %v1557_v43, 1e-16 }
 0x5ca   :  { %2906 = vrsqrt.f32 %v1558_v55 }
 0x5d4   :  { %v2907_v46 = vpop.eup %2906 }
 0x5d5   :  { %v1560_v60 = vmul.f32 %v2907_v46, %v1411_v56 }
 0x5d7   :  { %v1561_v61 = vmul.f32 %v3434_v5, %v1560_v60 }
 0x5d9   :  { %1562 = vadd.xlane.f32.xlu1 %v1561_v61 }
 0x666   :  { %v1563_v62 = vpop.xlane.xlu1 %1562 }
 0x667   :  { %v1564_v63 = vrot.slane %v1563_v62, 4 }
 0x669   :  { %v1565_v0 = vadd.f32 %v1564_v63, %v1563_v62 }
 0x66b   :  { %v1566_v1 = vrot.slane %v1565_v0, 2 }
 0x66d   :  { %v1567_v2 = vadd.f32 %v1566_v1, %v1565_v0 }
 0x66f   :  { %v1568_v3 = vrot.slane %v1567_v2, 1 }
 0x671   :  { %v1569_v4 = vadd.f32 %v1568_v3, %v1567_v2 }
 0x673   :  { %2875 = vpush %v1569_v4 }
 0x6a4   :  { %s2876_s27 = spop %2875 }
 0x6a5   :  { %v1571_v9 = vstv %s2876_s27 }
 0x6a6   :  { %v1572_v10 = vadd.f32 %v1571_v9, %v1162_v8 }
 0x6a8   :  { %1573 = vst [vmem:[#allocation14] sm:$0xff] %v1572_v10 }
 0x6a9   :  { %3073 = shalt.err (!%p3070_p4)
}
 0x6aa   :  { %s3074_s29 = scalar_lea.hbm %s3583_s11, 128 }
 0x6ab   :  { %p3075_p5 = scmp.ne.s32.totalorder %s3583_s11, %s3074_s29  ;;  %p3078_p6 = scmp.lt.u32.totalorder %s3074_s29, %s3583_s11 }
 0x6ad   :  { %p3080_p7 = pnand %p3078_p6, %p3075_p5 }
 0x6af   :  { %3083 = shalt.err (!%p3080_p7)
}
 0x6b0   :  { %1583 = dma.vmem_to_hbm [thread:$0]  %s1581_s26, 128, %s3583_s11, [#allocation4]  }
 0x6b1   :  { %3092 = dma.done.wait [#allocation4], 128  }
 0x6b2   :  { %3093 = vsyncadd [#allocation4], 4294967168 }
 0x6b3   :  { %1587 = vsyncpa [#allocation3], 1 }
 0x6b4   :  { %1588 = vsyncpa [#allocation6], 1 }
 0x6b5   :  { %1589 = vsyncpa [#allocation9], 1 }
 0x6b6   :  { %1590 = vsyncpa [#allocation12], 1 }
 0x6b7   :  { %1591 = vsyncpa [#allocation4], 1 }

</bundles_post_ra>
